<compile_context>
chip_gen: v5e
topology: v5e:2x2
jax: 0.10.0
libtpu: 0.0.40
codegen_flags: <defaults>
</compile_context>

<pallas_src>
import functools

import jax
import jax.numpy as jnp
from jax.experimental import pallas as pl
from jax.experimental.pallas import tpu as pltpu

HIDDEN = 1024  # fixed by the module: Linear(in_dim, 1024)


def _round_up(x, m):
    return ((x + m - 1) // m) * m


# --------------------------------------------------------------------------- #
# Kernels
# --------------------------------------------------------------------------- #
def _hidden_kernel(x_ref, w1_ref, b1_ref, h_ref):
    """h = relu(x @ W1 + b1), emitted in the dtype used by the second matmul."""
    h = jnp.dot(x_ref[...], w1_ref[...], preferred_element_type=jnp.float32)
    h = jnp.maximum(h + b1_ref[...], 0.0)
    h_ref[...] = h.astype(h_ref.dtype)


def _classifier_kernel(h_ref, w2_ref, b2_ref, out_ref):
    """One output-column tile: out = h @ W2_tile + b2_tile (f32 accumulation)."""
    out = jnp.dot(h_ref[...], w2_ref[...], preferred_element_type=jnp.float32)
    out_ref[...] = out + b2_ref[...]


def _compute_hidden(x, w1, b1, *, h_dtype):
    B, in_dim = x.shape
    return pl.pallas_call(
        _hidden_kernel,
        out_shape=jax.ShapeDtypeStruct((B, HIDDEN), h_dtype),
        grid_spec=pltpu.PrefetchScalarGridSpec(
            num_scalar_prefetch=0,
            grid=(1,),
            in_specs=[
                pl.BlockSpec((B, in_dim), lambda i: (0, 0)),
                pl.BlockSpec((in_dim, HIDDEN), lambda i: (0, 0)),
                pl.BlockSpec((1, HIDDEN), lambda i: (0, 0)),
            ],
            out_specs=pl.BlockSpec((B, HIDDEN), lambda i: (0, 0)),
        ),
    )(x, w1, b1.reshape(1, HIDDEN))


# --------------------------------------------------------------------------- #
# One-time weight preparation (call at model init, OUTSIDE the jitted forward)
# --------------------------------------------------------------------------- #
def prepare_classifier_params(w2, b2, *, num_vertices, num_classes,
                              tn=4096, w2_dtype=jnp.bfloat16):
    """
    Args:
      w2: [HIDDEN, num_vertices * num_classes] (math layout: [in, out]; column
          index = v * num_classes + c, matching PyTorch's view(B, V, C)).
      b2: [num_vertices * num_classes]
    Returns:
      w2_tiled: [num_tiles, HIDDEN, tn_eff] in `w2_dtype`, class-major columns,
                padded with zero columns up to a multiple of tn_eff, pre-tiled so
                each grid step streams one contiguous slab.
      b2_2d:    [1, N_pad] float32, same permutation/padding.
    """
    V, C = num_vertices, num_classes
    N = V * C
    assert w2.shape == (HIDDEN, N), w2.shape
    assert b2.shape == (N,), b2.shape

    # Permute columns from (vertex-major, class-minor) to (class-major,
    # vertex-minor): flat kernel output is then already [B, C*V].
    w2_cm = w2.reshape(HIDDEN, V, C).transpose(0, 2, 1).reshape(HIDDEN, N)
    b2_cm = b2.reshape(V, C).T.reshape(N)

    # Lane-dense output tile (multiple of 128), capped at the (rounded) width.
    tn_eff = _round_up(min(tn, _round_up(N, 128)), 128)
    N_pad = _round_up(N, tn_eff)
    if N_pad != N:
        w2_cm = jnp.pad(w2_cm, ((0, 0), (0, N_pad - N)))
        b2_cm = jnp.pad(b2_cm, (0, N_pad - N))

    num_tiles = N_pad // tn_eff
    # Pre-tile: tile j = columns [j*tn_eff : (j+1)*tn_eff]  -> [T, HIDDEN, tn_eff]
    # Real defaults (V=6890, C=70, tn=4096) give 118 tiles (even) -> balanced
    # megacore split on v7x along the "parallel" column axis.
    w2_tiled = (w2_cm.astype(w2_dtype)
                .reshape(HIDDEN, num_tiles, tn_eff)
                .transpose(1, 0, 2))
    b2_2d = b2_cm.reshape(1, N_pad).astype(jnp.float32)
    return w2_tiled, b2_2d


# --------------------------------------------------------------------------- #
# Jitted forward (weights already prepared)
# --------------------------------------------------------------------------- #
def semantic_classifier_forward(x, w1, b1, w2_tiled, b2_2d, *,
                                num_vertices, num_classes,
                                w2_buffer_count=2,
                                vmem_limit_bytes=40 * 1024 * 1024):
    """
    Args:
      x:  [B, in_dim] float32
      w1: [in_dim, HIDDEN], b1: [HIDDEN]
      w2_tiled, b2_2d: outputs of prepare_classifier_params (init-time prep).
    Returns:
      logits [B, num_classes, num_vertices]  (matches the PyTorch module output)
    """
    B, in_dim = x.shape
    T, H, tn_eff = w2_tiled.shape
    assert H == HIDDEN, w2_tiled.shape
    assert jnp.issubdtype(w2_tiled.dtype, jnp.floating), w2_tiled.dtype
    N_pad = T * tn_eff
    N = num_vertices * num_classes
    assert b2_2d.shape == (1, N_pad), b2_2d.shape

    # Hidden features once, in the W2-stream dtype (bf16 by default).
    h = _compute_hidden(x, w1, b1, h_dtype=w2_tiled.dtype)

    itemsize = jnp.dtype(w2_tiled.dtype).itemsize
    cost = pl.CostEstimate(
        flops=2 * B * HIDDEN * N_pad,
        transcendentals=0,
        bytes_accessed=(HIDDEN * N_pad * itemsize   # W2 stream (dominant)
                        + B * HIDDEN * itemsize     # h
                        + N_pad * 4                 # b2
                        + B * N_pad * 4),           # out
    )

    # W2 spec: pre-tiled [T, HIDDEN, tn_eff]; each grid step pulls one contiguous
    # slab. Optional deeper buffering on v7x via w2_buffer_count=3.
    w2_kwargs = {}
    if w2_buffer_count != 2:
        w2_kwargs["pipeline_mode"] = pl.Buffered(w2_buffer_count)
    w2_spec = pl.BlockSpec((pl.Squeezed(), HIDDEN, tn_eff),
                           lambda j: (j, 0, 0), **w2_kwargs)

    flat = pl.pallas_call(
        _classifier_kernel,
        out_shape=jax.ShapeDtypeStruct((B, N_pad), jnp.float32),
        grid_spec=pltpu.PrefetchScalarGridSpec(
            num_scalar_prefetch=0,
            grid=(T,),
            in_specs=[
                pl.BlockSpec((B, HIDDEN), lambda j: (0, 0)),  # h (resident)
                w2_spec,                                      # W2 slab (streamed)
                pl.BlockSpec((1, tn_eff), lambda j: (0, j)),  # b2 tile
            ],
            out_specs=pl.BlockSpec((B, tn_eff), lambda j: (0, j)),
        ),
        compiler_params=pltpu.CompilerParams(
            # No cross-step carry -> safe to parallelize (v7x megacore split).
            dimension_semantics=("parallel",),
            vmem_limit_bytes=vmem_limit_bytes,
        ),
        cost_estimate=cost,
    )(h, w2_tiled, b2_2d)

    # Drop padded columns; class-major layout means a plain reshape suffices.
    return flat[:, :N].reshape(B, num_classes, num_vertices)


# --------------------------------------------------------------------------- #
# Reference + self-test
# --------------------------------------------------------------------------- #
def _reference_forward(x, w1, b1, w2, b2, num_vertices, num_classes):
    feats = jnp.maximum(x @ w1 + b1, 0.0)
    preds = feats @ w2 + b2
    preds = preds.reshape(x.shape[0], num_vertices, num_classes)
    return jnp.transpose(preds, (0, 2, 1))


def _run_case(key, B, in_dim, num_classes, num_vertices, tn=4096):
    kx, k1, k2, k3, k4 = jax.random.split(key, 5)
    x = jax.random.normal(kx, (B, in_dim), dtype=jnp.float32)

    # PyTorch-Linear-style init: U(-1/sqrt(fan_in), 1/sqrt(fan_in))
    lim1 = 1.0 / jnp.sqrt(jnp.float32(in_dim))
    w1 = jax.random.uniform(k1, (in_dim, HIDDEN), jnp.float32, -lim1, lim1)
    b1 = jax.random.uniform(k2, (HIDDEN,), jnp.float32, -lim1, lim1)

    N = num_vertices * num_classes
    lim2 = 1.0 / jnp.sqrt(jnp.float32(HIDDEN))
    w2 = jax.random.uniform(k3, (HIDDEN, N), jnp.float32, -lim2, lim2)
    b2 = jax.random.uniform(k4, (N,), jnp.float32, -lim2, lim2)

    # One-time, init-time weight prep (outside jit).
    w2_tiled, b2_2d = prepare_classifier_params(
        w2, b2, num_vertices=num_vertices, num_classes=num_classes, tn=tn)
    w2_tiled = jax.block_until_ready(w2_tiled)

    fwd = jax.jit(functools.partial(semantic_classifier_forward,
                                    num_vertices=num_vertices,
                                    num_classes=num_classes))
    out = jax.block_until_ready(fwd(x, w1, b1, w2_tiled, b2_2d))
    ref = _reference_forward(x, w1, b1, w2, b2, num_vertices, num_classes)

    assert out.shape == (B, num_classes, num_vertices), out.shape
    # bf16 W2 stream + f32 accumulation: deliberate numerics deviation vs the
    # f32 PyTorch reference -> loose-but-tight-enough tolerance.
    assert jnp.allclose(out, ref, atol=2e-2, rtol=2e-2), "mismatch vs reference"


if __name__ == "__main__":
    key = jax.random.PRNGKey(0)
    k_a, k_b = jax.random.split(key)

    # Case A: N divisible by 128 (no padding path).
    _run_case(k_a, B=2, in_dim=32, num_classes=8, num_vertices=64)   # N = 512
    # Case B: N NOT divisible by 128 (exercises padding + column permutation),
    # mirroring the real defaults (V=6890, C=70) at small scale.
    _run_case(k_b, B=2, in_dim=32, num_classes=7, num_vertices=70)   # N = 490

    print("KERNEL_OK")
</pallas_src>

<mosaic_0001>
module attributes {stable_mosaic.version = 11 : i64} {
  func.func @_classifier_kernel(%arg0: i32, %arg1: memref<2x1024xbf16, #tpu.memory_space<vmem>>, %arg2: memref<1x1024x512xbf16, #tpu.memory_space<vmem>>, %arg3: memref<1x512xf32, #tpu.memory_space<vmem>>, %arg4: memref<2x512xf32, #tpu.memory_space<vmem>>) attributes {dimension_semantics = [#tpu.dimension_semantics<parallel>], iteration_bounds = array<i64: 1>, scalar_prefetch = 0 : i64, scratch_operands = 0 : i64, tpu.core_type = #tpu.core_type<tc>, window_params = [{pipeline_mode = #tpu.pipeline_mode<synchronous>, transform_indices = @transform_0, window_bounds = array<i64: 2, 1024>}, {transform_indices = @transform_1, window_bounds = array<i64: 1, 1024, 512>}, {transform_indices = @transform_2, window_bounds = array<i64: 1, 512>}, {transform_indices = @transform_3, window_bounds = array<i64: 2, 512>}]} {
    %c0 = arith.constant 0 : index
    %c0_0 = arith.constant 0 : index
    %0 = vector.load %arg1[%c0, %c0_0] : memref<2x1024xbf16, #tpu.memory_space<vmem>>, vector<2x1024xbf16>
    %c0_1 = arith.constant 0 : index
    %c0_2 = arith.constant 0 : index
    %c0_3 = arith.constant 0 : index
    %1 = vector.load %arg2[%c0_1, %c0_2, %c0_3] : memref<1x1024x512xbf16, #tpu.memory_space<vmem>>, vector<1x1024x512xbf16>
    %2 = vector.shape_cast %1 : vector<1x1024x512xbf16> to vector<1024x512xbf16>
    %cst = arith.constant dense<0.000000e+00> : vector<2x512xf32>
    %3 = tpu.matmul %0, %2, %cst {dimension_numbers = #tpu.dot_dimension_numbers<[1], [0], [0], [1], [0, 0, 1, 1], [], []>} : vector<2x1024xbf16>, vector<1024x512xbf16>, vector<2x512xf32> -> vector<2x512xf32>
    %c0_4 = arith.constant 0 : index
    %c0_5 = arith.constant 0 : index
    %4 = vector.load %arg3[%c0_4, %c0_5] : memref<1x512xf32, #tpu.memory_space<vmem>>, vector<1x512xf32>
    %5 = vector.broadcast %4 : vector<1x512xf32> to vector<2x512xf32>
    %6 = arith.addf %3, %5 : vector<2x512xf32>
    %c0_6 = arith.constant 0 : index
    %c0_7 = arith.constant 0 : index
    %7 = vector.load %arg4[%c0_6, %c0_7] : memref<2x512xf32, #tpu.memory_space<vmem>>, vector<2x512xf32>
    tpu.vector_store %arg4[%c0_6, %c0_7], %6 {strides = array<i32>} : memref<2x512xf32, #tpu.memory_space<vmem>>, vector<2x512xf32>,
    return
  }
  func.func @transform_0(%arg0: i32) -> (i32, i32) {
    %c0_i32 = arith.constant 0 : i32
    %c0_i32_0 = arith.constant 0 : i32
    %c0_i32_1 = arith.constant 0 : i32
    return %c0_i32, %c0_i32_0 : i32, i32
  }
  func.func @transform_1(%arg0: i32) -> (i32, i32, i32) {
    %c0_i32 = arith.constant 0 : i32
    %c0_i32_0 = arith.constant 0 : i32
    %c0_i32_1 = arith.constant 0 : i32
    return %arg0, %c0_i32, %c0_i32_0 : i32, i32, i32
  }
  func.func @transform_2(%arg0: i32) -> (i32, i32) {
    %c0_i32 = arith.constant 0 : i32
    %c0_i32_0 = arith.constant 0 : i32
    return %c0_i32, %arg0 : i32, i32
  }
  func.func @transform_3(%arg0: i32) -> (i32, i32) {
    %c0_i32 = arith.constant 0 : i32
    %c0_i32_0 = arith.constant 0 : i32
    return %c0_i32, %arg0 : i32, i32
  }
}

module attributes {stable_mosaic.version = 11 : i64} {
  func.func @_hidden_kernel(%arg0: i32, %arg1: memref<2x32xf32, #tpu.memory_space<vmem>>, %arg2: memref<32x1024xf32, #tpu.memory_space<vmem>>, %arg3: memref<1x1024xf32, #tpu.memory_space<vmem>>, %arg4: memref<2x1024xbf16, #tpu.memory_space<vmem>>) attributes {dimension_semantics = [#tpu.dimension_semantics<arbitrary>], iteration_bounds = array<i64: 1>, scalar_prefetch = 0 : i64, scratch_operands = 0 : i64, tpu.core_type = #tpu.core_type<tc>, window_params = [{pipeline_mode = #tpu.pipeline_mode<synchronous>, transform_indices = @transform_0, window_bounds = array<i64: 2, 32>}, {pipeline_mode = #tpu.pipeline_mode<synchronous>, transform_indices = @transform_1, window_bounds = array<i64: 32, 1024>}, {pipeline_mode = #tpu.pipeline_mode<synchronous>, transform_indices = @transform_2, window_bounds = array<i64: 1, 1024>}, {pipeline_mode = #tpu.pipeline_mode<synchronous>, transform_indices = @transform_3, window_bounds = array<i64: 2, 1024>}]} {
    %c0 = arith.constant 0 : index
    %c0_0 = arith.constant 0 : index
    %0 = vector.load %arg1[%c0, %c0_0] : memref<2x32xf32, #tpu.memory_space<vmem>>, vector<2x32xf32>
    %c0_1 = arith.constant 0 : index
    %c0_2 = arith.constant 0 : index
    %1 = vector.load %arg2[%c0_1, %c0_2] : memref<32x1024xf32, #tpu.memory_space<vmem>>, vector<32x1024xf32>
    %cst = arith.constant dense<0.000000e+00> : vector<2x1024xf32>
    %2 = tpu.matmul %0, %1, %cst {dimension_numbers = #tpu.dot_dimension_numbers<[1], [0], [0], [1], [0, 0, 1, 1], [], []>} : vector<2x32xf32>, vector<32x1024xf32>, vector<2x1024xf32> -> vector<2x1024xf32>
    %c0_3 = arith.constant 0 : index
    %c0_4 = arith.constant 0 : index
    %3 = vector.load %arg3[%c0_3, %c0_4] : memref<1x1024xf32, #tpu.memory_space<vmem>>, vector<1x1024xf32>
    %4 = vector.broadcast %3 : vector<1x1024xf32> to vector<2x1024xf32>
    %5 = arith.addf %2, %4 : vector<2x1024xf32>
    %cst_5 = arith.constant 0.000000e+00 : f32
    %6 = vector.broadcast %cst_5 : f32 to vector<2x1024xf32>
    %7 = arith.maximumf %5, %6 : vector<2x1024xf32>
    %8 = arith.truncf %7 : vector<2x1024xf32> to vector<2x1024xbf16>
    %c0_6 = arith.constant 0 : index
    %c0_7 = arith.constant 0 : index
    %9 = vector.load %arg4[%c0_6, %c0_7] : memref<2x1024xbf16, #tpu.memory_space<vmem>>, vector<2x1024xbf16>
    tpu.vector_store %arg4[%c0_6, %c0_7], %8 {strides = array<i32>} : memref<2x1024xbf16, #tpu.memory_space<vmem>>, vector<2x1024xbf16>,
    return
  }
  func.func @transform_0(%arg0: i32) -> (i32, i32) {
    %c0_i32 = arith.constant 0 : i32
    %c0_i32_0 = arith.constant 0 : i32
    %c0_i32_1 = arith.constant 0 : i32
    return %c0_i32, %c0_i32_0 : i32, i32
  }
  func.func @transform_1(%arg0: i32) -> (i32, i32) {
    %c0_i32 = arith.constant 0 : i32
    %c0_i32_0 = arith.constant 0 : i32
    %c0_i32_1 = arith.constant 0 : i32
    return %c0_i32, %c0_i32_0 : i32, i32
  }
  func.func @transform_2(%arg0: i32) -> (i32, i32) {
    %c0_i32 = arith.constant 0 : i32
    %c0_i32_0 = arith.constant 0 : i32
    %c0_i32_1 = arith.constant 0 : i32
    return %c0_i32, %c0_i32_0 : i32, i32
  }
  func.func @transform_3(%arg0: i32) -> (i32, i32) {
    %c0_i32 = arith.constant 0 : i32
    %c0_i32_0 = arith.constant 0 : i32
    %c0_i32_1 = arith.constant 0 : i32
    return %c0_i32, %c0_i32_0 : i32, i32
  }
}

</mosaic_0001>

<bundles_post_ra>
// kernel: semantic_classifier_forward.2
= control target key start
LH: loop header
LB: loop body
LE: loop exit
PB: predicated region body
PF: predicated region fallthrough
CT: control target
= control target key end

     0   :  { %8 = vsyncpa [#allocation3], 0  ;;  %s459_s0 = inlined_call_operand.hbm [shape: f32[2,32], index: 0, kind: input, shape index: {}]   ;;  %s460_s1 = inlined_call_operand.hbm [shape: f32[32,1024], index: 1, kind: input, shape index: {}]   ;;  %s461_s2 = inlined_call_operand.hbm [shape: f32[1,1024], index: 2, kind: input, shape index: {}]   ;;  %s462_s3 = inlined_call_operand.vmem [shape: bf16[2,1024], index: 3, kind: output, shape index: {}]  }
   0x1   :  { %9 = vsyncpa [#allocation5], 0  ;;  %s25_s14 = sshll.u32 %s460_s1, 4  ;;  %s414_s15 = smov [#allocation4]   ;;  %s26_s14 = int_to_ptr.hbm [resolvable:$true] %s25_s14 }
   0x2   :  { %s27_s16 = sshll.u32 %s414_s15, 4  ;;  %s15_s19 = sshll.u32 %s459_s0, 4  ;;  %s28_s16 = int_to_ptr.vmem [resolvable:$true] %s27_s16  ;;  %s16_s19 = int_to_ptr.hbm [resolvable:$true] %s15_s19 }
   0x3   :  { %s415_s20 = smov 1024   ;;  %s416_s21 = smov 64  }
   0x4   :  { %33 = dma.hbm_to_vmem [thread:$0]  %s26_s14, 4096, %s28_s16, [#allocation5], %s415_s20, %s415_s20, %s416_s21  }
   0x5   :  { %s417_s22 = smov [#allocation2]   ;;  %s39_s26 = sshll.u32 %s461_s2, 4  ;;  %s40_s26 = int_to_ptr.hbm [resolvable:$true] %s39_s26 }
   0x6   :  { %s17_s23 = sshll.u32 %s417_s22, 4  ;;  %s418_s1 = smov [#allocation6]   ;;  %s18_s23 = int_to_ptr.vmem [resolvable:$true] %s17_s23 }
   0x7   :  { %20 = dma.hbm_to_vmem [thread:$0]  %s16_s19, 32, %s18_s23, [#allocation3]  }
   0x8   :  { %s41_s27 = sshll.u32 %s418_s1, 4  ;;  %s42_s27 = int_to_ptr.vmem [resolvable:$true] %s41_s27 }
   0x9   :  { %44 = dma.hbm_to_vmem [thread:$0]  %s40_s26, 128, %s42_s27, [#allocation5]  }
   0xa   :  { %410 = dma.done.wait [#allocation3], 32  }
   0xb   :  { %411 = vsyncadd [#allocation3], 4294967264 }
   0xc   :  { %412 = dma.done.wait [#allocation5], 4224  }
   0xd   :  { %413 = vsyncadd [#allocation5], 4294963072  ;;  %v84_v0 = vld [vmem:[#allocation4 + $0xd0] sm:$0xff]  ;;  %v85_v1 = vld [vmem:[#allocation4 + $0xd8] sm:$0xff]  ;;  %vm108_vm0 = vcmask 261120   ;;  %vm299_vm1 = vcmask 1042434  }
   0xe   :  { %v76_v2 = vld [vmem:[#allocation4 + $0x90] sm:$0xff]  ;;  %164 = vmatpush.msra.mxu2 %v84_v0  ;;  %184 = vmatpush.msra.mxu3 %v85_v1  ;;  %v77_v3 = vld [vmem:[#allocation4 + $0x98] sm:$0xff]  ;;  %v82_v4 = vld [vmem:[#allocation4 + $0xc0] sm:$0xff]  ;;  %vm305_vm2 = vcmask 1044484   ;;  %vm295_vm3 = vcmask 1040384   ;;  %vm303_vm4 = vcmask 1041408  }
   0xf   :  { %v83_v5 = vld [vmem:[#allocation4 + $0xc8] sm:$0xff]  ;;  %124 = vmatpush.msra.mxu0 %v82_v4  ;;  %v68_v6 = vld [vmem:[#allocation4 + $0x50] sm:$0xff]  ;;  %v69_v7 = vld [vmem:[#allocation4 + $0x58] sm:$0xff]  ;;  %vm309_vm5 = vcmask 1046534   ;;  %vm313_vm6 = vcmask 1045508   ;;  %vm315_vm7 = vcmask 1043456  }
  0x10   :  { %144 = vmatpush.msra.mxu1 %v83_v5  ;;  %v74_v8 = vld [vmem:[#allocation4 + $0x80] sm:$0xff]  ;;  %165 = vmatpush.msra.mxu2 %v76_v2  ;;  %v75_v9 = vld [vmem:[#allocation4 + $0x88] sm:$0xff]  ;;  %v60_v10 = vld [vmem:[#allocation4 + $0x10] sm:$0xff] }
  0x11   :  { %185 = vmatpush.msra.mxu3 %v77_v3  ;;  %125 = vmatpush.msra.mxu0 %v74_v8  ;;  %v61_v11 = vld [vmem:[#allocation4 + $0x18] sm:$0xff]  ;;  %v66_v13 = vld [vmem:[#allocation4 + $0x40] sm:$0xff]  ;;  %v67_v14 = vld [vmem:[#allocation4 + $0x48] sm:$0xff] }
  0x12   :  { %145 = vmatpush.msra.mxu1 %v75_v9  ;;  %166 = vmatpush.msra.mxu2 %v68_v6  ;;  %v57_v12 = vld [vmem:[#allocation2] sm:$0x3]  ;;  %v88_v15 = vld [vmem:[#allocation4 + $0xf0] sm:$0xff]  ;;  %v58_v17 = vld [vmem:[#allocation4] sm:$0xff] }
  0x13   :  { %186 = vmatpush.msra.mxu3 %v69_v7  ;;  %v89_v16 = vld [vmem:[#allocation4 + $0xf8] sm:$0xff]  ;;  %126 = vmatpush.msra.mxu0 %v66_v13  ;;  %v59_v18 = vld [vmem:[#allocation4 + $0x8] sm:$0xff]  ;;  %v80_v19 = vld [vmem:[#allocation4 + $0xb0] sm:$0xff] }
  0x14   :  { %146 = vmatpush.msra.mxu1 %v67_v14  ;;  %167 = vmatpush.msra.mxu2 %v60_v10  ;;  %v81_v20 = vld [vmem:[#allocation4 + $0xb8] sm:$0xff]  ;;  %v72_v21 = vld [vmem:[#allocation4 + $0x70] sm:$0xff]  ;;  %v86_v23 = vld [vmem:[#allocation4 + $0xe0] sm:$0xff] }
  0x15   :  { %187 = vmatpush.msra.mxu3 %v61_v11  ;;  %327 = vmatmul.msk.f32.vlgmr.msra.gmra.mxu2 %vm108_vm0, %v57_v12  ;;  %v73_v22 = vld [vmem:[#allocation4 + $0x78] sm:$0xff]  ;;  %v87_v24 = vld [vmem:[#allocation4 + $0xe8] sm:$0xff]  ;;  %v64_v25 = vld [vmem:[#allocation4 + $0x30] sm:$0xff] }
  0x16   :  { %328 = vmatmul.msk.f32.vlgmr.msra.gmra.mxu3 %vm108_vm0, %v57_v12  ;;  %244 = vmatpush.msrb.mxu2 %v88_v15  ;;  %v65_v26 = vld [vmem:[#allocation4 + $0x38] sm:$0xff]  ;;  %v78_v27 = vld [vmem:[#allocation4 + $0xa0] sm:$0xff]  ;;  %v79_v28 = vld [vmem:[#allocation4 + $0xa8] sm:$0xff] }
  0x17   :  { %264 = vmatpush.msrb.mxu3 %v89_v16  ;;  %127 = vmatpush.msra.mxu0 %v58_v17  ;;  %v70_v29 = vld [vmem:[#allocation4 + $0x60] sm:$0xff]  ;;  %v71_v30 = vld [vmem:[#allocation4 + $0x68] sm:$0xff] }
  0x18   :  { %147 = vmatpush.msra.mxu1 %v59_v18  ;;  %245 = vmatpush.msrb.mxu2 %v80_v19  ;;  %v62_v31 = vld [vmem:[#allocation4 + $0x20] sm:$0xff]  ;;  %v63_v32 = vld [vmem:[#allocation4 + $0x28] sm:$0xff] }
  0x19   :  { %265 = vmatpush.msrb.mxu3 %v81_v20  ;;  %325 = vmatmul.msk.f32.vlgmr.msra.gmra.mxu0 %vm108_vm0, %v57_v12  ;;  %v90_v33 = vld [vmem:[#allocation6] sm:$0xff] }
  0x1a   :  { %326 = vmatmul.msk.f32.vlgmr.msra.gmra.mxu1 %vm108_vm0, %v57_v12  ;;  %246 = vmatpush.msrb.mxu2 %v72_v21  ;;  %v94_v34 = vperm.slane %v90_v33, 2  ;;  %v95_v35 = vperm.slane %v90_v33, 3  ;;  %v92_v36 = vperm.slane %v90_v33, 0  ;;  %v93_v38 = vperm.slane %v90_v33, 1 }
  0x1b   :  { %266 = vmatpush.msrb.mxu3 %v73_v22  ;;  %204 = vmatpush.msrb.mxu0 %v86_v23  ;;  %v96_v46 = vperm.slane %v90_v33, 4  ;;  %v97_v47 = vperm.slane %v90_v33, 5  ;;  %v98_v50 = vperm.slane %v90_v33, 6  ;;  %v99_v55 = vperm.slane %v90_v33, 7 }
  0x1c   :  { %224 = vmatpush.msrb.mxu1 %v87_v24  ;;  %247 = vmatpush.msrb.mxu2 %v64_v25 }
  0x1d   :  { %267 = vmatpush.msrb.mxu3 %v65_v26  ;;  %205 = vmatpush.msrb.mxu0 %v78_v27 }
  0x1e   :  { %225 = vmatpush.msrb.mxu1 %v79_v28  ;;  %331 = vmatmul.msk.f32.vlgmr.msrb.gmra.mxu2 %vm108_vm0, %v57_v12 }
  0x1f   :  { %332 = vmatmul.msk.f32.vlgmr.msrb.gmra.mxu3 %vm108_vm0, %v57_v12  ;;  %206 = vmatpush.msrb.mxu0 %v70_v29 }
  0x20   :  { %226 = vmatpush.msrb.mxu1 %v71_v30 }
  0x21   :  { %207 = vmatpush.msrb.mxu0 %v62_v31 }
  0x22   :  { %227 = vmatpush.msrb.mxu1 %v63_v32  ;;  %329 = vmatmul.msk.f32.vlgmr.msrb.gmra.mxu0 %vm108_vm0, %v57_v12 }
  0x23   :  { %330 = vmatmul.msk.f32.vlgmr.msrb.gmra.mxu1 %vm108_vm0, %v57_v12 }
  0x96   :  { %v129_v37 = vpop.f32.mrf.mxu0 }
  0x97   :  { %v149_v39 = vpop.f32.mrf.mxu1  ;;  %v130_v44 = vadd.f32 %v129_v37, %v92_v36 }
  0x98   :  { %v169_v40 = vpop.f32.mrf.mxu2  ;;  %v150_v45 = vadd.f32 %v149_v39, %v93_v38 }
  0x99   :  { %v189_v41 = vpop.f32.mrf.mxu3  ;;  %v170_v42 = vadd.f32 %v169_v40, %v94_v34  ;;  %v272_v51 = vmax.f32 %v130_v44, 0.0 }
  0x9a   :  { %v190_v43 = vadd.f32 %v189_v41, %v95_v35  ;;  %v273_v52 = vmax.f32 %v150_v45, 0.0 }
  0x9b   :  { %v274_v48 = vmax.f32 %v170_v42, 0.0 }
  0x9c   :  { %v275_v49 = vmax.f32 %v190_v43, 0.0  ;;  %v280_v0 = vpack.c.bf16 %v273_v52, %v272_v51 }
  0x9e   :  { %v281_v58 = vpack.c.bf16 %v275_v49, %v274_v48  ;;  %v288_v9 = vrot.slane %v280_v0, 3 }
  0x9f   :  { %v209_v53 = vpop.f32.mrf.mxu0 }
  0xa0   :  { %v229_v54 = vpop.f32.mrf.mxu1  ;;  %v210_v56 = vadd.f32 %v209_v53, %v96_v46  ;;  %v289_v4 = vrot.slane %v281_v58, 6  ;;  %v290_v5 = vrot.slane %v281_v58, 1  ;;  %v298_v15 = vsel %vm295_vm3, %v280_v0, %v288_v9 }
  0xa1   :  { %v230_v57 = vadd.f32 %v229_v54, %v97_v47  ;;  %v249_v59 = vpop.f32.mrf.mxu2 }
  0xa2   :  { %v269_v60 = vpop.f32.mrf.mxu3  ;;  %v276_v61 = vmax.f32 %v210_v56, 0.0  ;;  %v250_v63 = vadd.f32 %v249_v59, %v98_v50  ;;  %v302_v11 = vsel %vm299_vm1, %v289_v4, %v290_v5 }
  0xa3   :  { %v277_v62 = vmax.f32 %v230_v57, 0.0  ;;  %v270_v1 = vadd.f32 %v269_v60, %v99_v55  ;;  %v304_v17 = vsel %vm303_vm4, %v298_v15, %v302_v11 }
  0xa4   :  { %v278_v3 = vmax.f32 %v250_v63, 0.0 }
  0xa5   :  { %v282_v2 = vpack.c.bf16 %v277_v62, %v276_v61  ;;  %v279_v6 = vmax.f32 %v270_v1, 0.0 }
  0xa7   :  { %v291_v7 = vrot.slane %v282_v2, 4  ;;  %v292_v8 = vrot.slane %v282_v2, 7  ;;  %v283_v10 = vpack.c.bf16 %v279_v6, %v278_v3 }
  0xa9   :  { %v308_v12 = vsel %vm305_vm2, %v291_v7, %v292_v8  ;;  %v293_v13 = vrot.slane %v283_v10, 2  ;;  %v294_v14 = vrot.slane %v283_v10, 5 }
  0xab   :  { %v312_v16 = vsel %vm309_vm5, %v293_v13, %v294_v14 }
  0xac   :  { %v314_v18 = vsel %vm313_vm6, %v308_v12, %v312_v16 }
  0xad   :  { %v316_v19 = vsel %vm315_vm7, %v304_v17, %v314_v18 }
  0xae   :  { %318 = vst [vmem:[%s462_s3] sm:$0xff] %v316_v19 }
  0xaf   :  { %323 = vsyncpa [#allocation3], 1 }
  0xb0   :  { %324 = vsyncpa [#allocation5], 1 }

// kernel: semantic_classifier_forward.3
= control target key start
LH: loop header
LB: loop body
LE: loop exit
PB: predicated region body
PF: predicated region fallthrough
CT: control target
= control target key end

     0   :  { %8 = vsyncpa [#allocation3], 0  ;;  %s3348_s15 = smov [#allocation2]   ;;  %s3349_s17 = smov 256   ;;  %s3447_s0 = inlined_call_operand.vmem [shape: bf16[2,1024], index: 0, kind: input, shape index: {}]   ;;  %s3448_s1 = inlined_call_operand.hbm [shape: bf16[1,1024,512], index: 1, kind: input, shape index: {}]   ;;  %s3449_s2 = inlined_call_operand.vmem [shape: f32[1,512], index: 2, kind: input, shape index: {}]   ;;  %s3450_s3 = inlined_call_operand.vmem [shape: f32[2,512], index: 3, kind: output, shape index: {}]  }
   0x1   :  { %s15_s14 = sshll.u32 %s3448_s1, 4  ;;  %s17_s16 = sshll.u32 %s3348_s15, 4  ;;  %s16_s14 = int_to_ptr.hbm [resolvable:$true] %s15_s14  ;;  %s18_s16 = int_to_ptr.vmem [resolvable:$true] %s17_s16 }
   0x2   :  { %s3350_s18 = smov 16  }
   0x3   :  { %23 = dma.hbm_to_vmem [thread:$0]  %s16_s14, 32768, %s18_s16, [#allocation3], %s3349_s17, %s3349_s17, %s3350_s18  }
   0x4   :  { %3346 = dma.done.wait [#allocation3], 32768  }
   0x5   :  { %3347 = vsyncadd [#allocation3], 4294934528  ;;  %v2145_v0 = vld [vmem:[#allocation2 + $0xe0] sm:$0xf]  ;;  %v3085_v1 = vld [vmem:[#allocation2 + $0xec] sm:$0xf0] }
   0x6   :  { %v2273_v2 = vld [vmem:[#allocation2 + $0x1e0] sm:$0xf]  ;;  %v2146_v3 = vor.u32 %v3085_v1, %v2145_v0  ;;  %v3117_v4 = vld [vmem:[#allocation2 + $0x1ec] sm:$0xf0]  ;;  %vm2018_vm0 = vcmask 1041408   ;;  %vm2020_vm1 = vcmask 1045508  }
   0x7   :  { %v2401_v5 = vld [vmem:[#allocation2 + $0x2e0] sm:$0xf]  ;;  %v3149_v6 = vld [vmem:[#allocation2 + $0x2ec] sm:$0xf0]  ;;  %v2274_v7 = vor.u32 %v3117_v4, %v2273_v2  ;;  %vm2022_vm2 = vcmask 1043456  }
   0x8   :  { %v2402_v8 = vor.u32 %v3149_v6, %v2401_v5  ;;  %v2529_v9 = vld [vmem:[#allocation2 + $0x3e0] sm:$0xf]  ;;  %v3181_v10 = vld [vmem:[#allocation2 + $0x3ec] sm:$0xf0]  ;;  %1595 = vmatpush.bf16.msra.mxu0 %v2146_v3 }
   0x9   :  { %v2129_v11 = vld [vmem:[#allocation2 + $0xc0] sm:$0xf]  ;;  %v2530_v12 = vor.u32 %v3181_v10, %v2529_v9  ;;  %v3081_v13 = vld [vmem:[#allocation2 + $0xcc] sm:$0xf0]  ;;  %1608 = vmatpush.bf16.msra.mxu1 %v2274_v7 }
   0xa   :  { %v2257_v14 = vld [vmem:[#allocation2 + $0x1c0] sm:$0xf]  ;;  %v3113_v15 = vld [vmem:[#allocation2 + $0x1cc] sm:$0xf0]  ;;  %1621 = vmatpush.bf16.msra.mxu2 %v2402_v8  ;;  %v2130_v16 = vor.u32 %v3081_v13, %v2129_v11 }
   0xb   :  { %v2258_v17 = vor.u32 %v3113_v15, %v2257_v14  ;;  %v2385_v18 = vld [vmem:[#allocation2 + $0x2c0] sm:$0xf]  ;;  %v3145_v19 = vld [vmem:[#allocation2 + $0x2cc] sm:$0xf0]  ;;  %1634 = vmatpush.bf16.msra.mxu3 %v2530_v12 }
   0xc   :  { %v2513_v20 = vld [vmem:[#allocation2 + $0x3c0] sm:$0xf]  ;;  %v2386_v21 = vor.u32 %v3145_v19, %v2385_v18  ;;  %v3177_v22 = vld [vmem:[#allocation2 + $0x3cc] sm:$0xf0]  ;;  %1596 = vmatpush.bf16.msra.mxu0 %v2130_v16 }
   0xd   :  { %v2113_v23 = vld [vmem:[#allocation2 + $0xa0] sm:$0xf]  ;;  %v3077_v24 = vld [vmem:[#allocation2 + $0xac] sm:$0xf0]  ;;  %v2514_v25 = vor.u32 %v3177_v22, %v2513_v20  ;;  %1609 = vmatpush.bf16.msra.mxu1 %v2258_v17 }
   0xe   :  { %v2241_v26 = vld [vmem:[#allocation2 + $0x1a0] sm:$0xf]  ;;  %v3109_v27 = vld [vmem:[#allocation2 + $0x1ac] sm:$0xf0]  ;;  %v2114_v29 = vor.u32 %v3077_v24, %v2113_v23  ;;  %1622 = vmatpush.bf16.msra.mxu2 %v2386_v21 }
   0xf   :  { %v2369_v28 = vld [vmem:[#allocation2 + $0x2a0] sm:$0xf]  ;;  %v3141_v30 = vld [vmem:[#allocation2 + $0x2ac] sm:$0xf0]  ;;  %v2242_v33 = vor.u32 %v3109_v27, %v2241_v26  ;;  %1635 = vmatpush.bf16.msra.mxu3 %v2514_v25 }
  0x10   :  { %v2497_v31 = vld [vmem:[#allocation2 + $0x3a0] sm:$0xf]  ;;  %v3173_v32 = vld [vmem:[#allocation2 + $0x3ac] sm:$0xf0]  ;;  %v2370_v34 = vor.u32 %v3141_v30, %v2369_v28  ;;  %1597 = vmatpush.bf16.msra.mxu0 %v2114_v29 }
  0x11   :  { %v2097_v35 = vld [vmem:[#allocation2 + $0x80] sm:$0xf]  ;;  %v3073_v36 = vld [vmem:[#allocation2 + $0x8c] sm:$0xf0]  ;;  %v2498_v38 = vor.u32 %v3173_v32, %v2497_v31  ;;  %1610 = vmatpush.bf16.msra.mxu1 %v2242_v33 }
  0x12   :  { %v2225_v37 = vld [vmem:[#allocation2 + $0x180] sm:$0xf]  ;;  %v3105_v39 = vld [vmem:[#allocation2 + $0x18c] sm:$0xf0]  ;;  %v2098_v44 = vor.u32 %v3073_v36, %v2097_v35  ;;  %1623 = vmatpush.bf16.msra.mxu2 %v2370_v34 }
  0x13   :  { %v2353_v40 = vld [vmem:[#allocation2 + $0x280] sm:$0xf]  ;;  %v3137_v41 = vld [vmem:[#allocation2 + $0x28c] sm:$0xf0]  ;;  %v2226_v45 = vor.u32 %v3105_v39, %v2225_v37  ;;  %1636 = vmatpush.bf16.msra.mxu3 %v2498_v38 }
  0x14   :  { %v2481_v42 = vld [vmem:[#allocation2 + $0x380] sm:$0xf]  ;;  %v3169_v43 = vld [vmem:[#allocation2 + $0x38c] sm:$0xf0]  ;;  %v2354_v46 = vor.u32 %v3137_v41, %v2353_v40  ;;  %1598 = vmatpush.bf16.msra.mxu0 %v2098_v44 }
  0x15   :  { %v2081_v47 = vld [vmem:[#allocation2 + $0x60] sm:$0xf]  ;;  %v3069_v48 = vld [vmem:[#allocation2 + $0x6c] sm:$0xf0]  ;;  %v2482_v50 = vor.u32 %v3169_v43, %v2481_v42  ;;  %1611 = vmatpush.bf16.msra.mxu1 %v2226_v45 }
  0x16   :  { %v2209_v49 = vld [vmem:[#allocation2 + $0x160] sm:$0xf]  ;;  %v3101_v51 = vld [vmem:[#allocation2 + $0x16c] sm:$0xf0]  ;;  %v2082_v56 = vor.u32 %v3069_v48, %v2081_v47  ;;  %1624 = vmatpush.bf16.msra.mxu2 %v2354_v46 }
  0x17   :  { %v2337_v52 = vld [vmem:[#allocation2 + $0x260] sm:$0xf]  ;;  %v3133_v53 = vld [vmem:[#allocation2 + $0x26c] sm:$0xf0]  ;;  %v2210_v57 = vor.u32 %v3101_v51, %v2209_v49  ;;  %1637 = vmatpush.bf16.msra.mxu3 %v2482_v50 }
  0x18   :  { %v2465_v54 = vld [vmem:[#allocation2 + $0x360] sm:$0xf]  ;;  %v3165_v55 = vld [vmem:[#allocation2 + $0x36c] sm:$0xf0]  ;;  %v2338_v58 = vor.u32 %v3133_v53, %v2337_v52  ;;  %1599 = vmatpush.bf16.msra.mxu0 %v2082_v56 }
  0x19   :  { %v2065_v59 = vld [vmem:[#allocation2 + $0x40] sm:$0xf]  ;;  %v3065_v60 = vld [vmem:[#allocation2 + $0x4c] sm:$0xf0]  ;;  %v2466_v62 = vor.u32 %v3165_v55, %v2465_v54  ;;  %1612 = vmatpush.bf16.msra.mxu1 %v2210_v57 }
  0x1a   :  { %v2193_v61 = vld [vmem:[#allocation2 + $0x140] sm:$0xf]  ;;  %v3097_v63 = vld [vmem:[#allocation2 + $0x14c] sm:$0xf0]  ;;  %v2066_v4 = vor.u32 %v3065_v60, %v2065_v59  ;;  %1625 = vmatpush.bf16.msra.mxu2 %v2338_v58  ;;  %v30_v59 = vld [vmem:[%s3447_s0] sm:$0xff] }
  0x1b   :  { %v2321_v0 = vld [vmem:[#allocation2 + $0x240] sm:$0xf]  ;;  %v3129_v1 = vld [vmem:[#allocation2 + $0x24c] sm:$0xf0]  ;;  %v2194_v5 = vor.u32 %v3097_v63, %v2193_v61  ;;  %1638 = vmatpush.bf16.msra.mxu3 %v2466_v62  ;;  %298 = vst [vmem:[#allocation1] ss:$9 sm:$0xff] %v30_v59 }
  0x1c   :  { %v2449_v2 = vld [vmem:[#allocation2 + $0x340] sm:$0xf]  ;;  %v3161_v3 = vld [vmem:[#allocation2 + $0x34c] sm:$0xf0]  ;;  %v2322_v6 = vor.u32 %v3129_v1, %v2321_v0  ;;  %1600 = vmatpush.bf16.msra.mxu0 %v2066_v4 }
  0x1d   :  { %v2049_v7 = vld [vmem:[#allocation2 + $0x20] sm:$0xf]  ;;  %v3061_v8 = vld [vmem:[#allocation2 + $0x2c] sm:$0xf0]  ;;  %v2450_v10 = vor.u32 %v3161_v3, %v2449_v2  ;;  %1613 = vmatpush.bf16.msra.mxu1 %v2194_v5 }
  0x1e   :  { %v2177_v9 = vld [vmem:[#allocation2 + $0x120] sm:$0xf]  ;;  %v3093_v11 = vld [vmem:[#allocation2 + $0x12c] sm:$0xf0]  ;;  %v2050_v16 = vor.u32 %v3061_v8, %v2049_v7  ;;  %1626 = vmatpush.bf16.msra.mxu2 %v2322_v6 }
  0x1f   :  { %v2305_v12 = vld [vmem:[#allocation2 + $0x220] sm:$0xf]  ;;  %v3125_v13 = vld [vmem:[#allocation2 + $0x22c] sm:$0xf0]  ;;  %v2178_v19 = vor.u32 %v3093_v11, %v2177_v9  ;;  %1639 = vmatpush.bf16.msra.mxu3 %v2450_v10 }
  0x20   :  { %v2433_v14 = vld [vmem:[#allocation2 + $0x320] sm:$0xf]  ;;  %v3157_v15 = vld [vmem:[#allocation2 + $0x32c] sm:$0xf0]  ;;  %v2306_v20 = vor.u32 %v3125_v13, %v2305_v12  ;;  %1601 = vmatpush.bf16.msra.mxu0 %v2050_v16 }
  0x21   :  { %v2033_v17 = vld [vmem:[#allocation2] sm:$0xf]  ;;  %v3057_v18 = vld [vmem:[#allocation2 + $0xc] sm:$0xf0]  ;;  %v2434_v24 = vor.u32 %v3157_v15, %v2433_v14  ;;  %1614 = vmatpush.bf16.msra.mxu1 %v2178_v19 }
  0x22   :  { %v2161_v21 = vld [vmem:[#allocation2 + $0x100] sm:$0xf]  ;;  %v3089_v22 = vld [vmem:[#allocation2 + $0x10c] sm:$0xf0]  ;;  %v2034_v31 = vor.u32 %v3057_v18, %v2033_v17  ;;  %1627 = vmatpush.bf16.msra.mxu2 %v2306_v20 }
  0x23   :  { %v2289_v23 = vld [vmem:[#allocation2 + $0x200] sm:$0xf]  ;;  %v3121_v25 = vld [vmem:[#allocation2 + $0x20c] sm:$0xf0]  ;;  %v2162_v35 = vor.u32 %v3089_v22, %v2161_v21  ;;  %1640 = vmatpush.bf16.msra.mxu3 %v2434_v24  ;;  %v3379_v21 = vld [vmem:[#allocation1] sm:$0xff] }
  0x24   :  { %v2417_v26 = vld [vmem:[#allocation2 + $0x300] sm:$0xf]  ;;  %v3153_v27 = vld [vmem:[#allocation2 + $0x30c] sm:$0xf0]  ;;  %v2290_v36 = vor.u32 %v3121_v25, %v2289_v23  ;;  %1602 = vmatpush.bf16.msra.mxu0 %v2034_v31 }
  0x25   :  { %v2657_v28 = vld [vmem:[#allocation2 + $0x4e0] sm:$0xf]  ;;  %v3213_v29 = vld [vmem:[#allocation2 + $0x4ec] sm:$0xf0]  ;;  %v2418_v39 = vor.u32 %v3153_v27, %v2417_v26  ;;  %1615 = vmatpush.bf16.msra.mxu1 %v2162_v35 }
  0x26   :  { %v2785_v30 = vld [vmem:[#allocation2 + $0x5e0] sm:$0xf]  ;;  %v3245_v32 = vld [vmem:[#allocation2 + $0x5ec] sm:$0xf0]  ;;  %v2658_v40 = vor.u32 %v3213_v29, %v2657_v28  ;;  %1628 = vmatpush.bf16.msra.mxu2 %v2290_v36 }
  0x27   :  { %v2913_v33 = vld [vmem:[#allocation2 + $0x6e0] sm:$0xf]  ;;  %v3277_v34 = vld [vmem:[#allocation2 + $0x6ec] sm:$0xf0]  ;;  %v2786_v41 = vor.u32 %v3245_v32, %v2785_v30  ;;  %1641 = vmatpush.bf16.msra.mxu3 %v2418_v39  ;;  %1603 = vmatmul.bf16.vlgmr.msra.gmra.mxu0 %v3379_v21 }
  0x28   :  { %v3041_v37 = vld [vmem:[#allocation2 + $0x7e0] sm:$0xf]  ;;  %v3309_v38 = vld [vmem:[#allocation2 + $0x7ec] sm:$0xf0]  ;;  %v2914_v42 = vor.u32 %v3277_v34, %v2913_v33  ;;  %1647 = vmatpush.bf16.msrb.mxu0 %v2658_v40 }
  0x29   :  { %v2641_v43 = vld [vmem:[#allocation2 + $0x4c0] sm:$0xf]  ;;  %v3209_v44 = vld [vmem:[#allocation2 + $0x4cc] sm:$0xf0]  ;;  %v3042_v46 = vor.u32 %v3309_v38, %v3041_v37  ;;  %1660 = vmatpush.bf16.msrb.mxu1 %v2786_v41 }
  0x2a   :  { %v2769_v45 = vld [vmem:[#allocation2 + $0x5c0] sm:$0xf]  ;;  %v3241_v47 = vld [vmem:[#allocation2 + $0x5cc] sm:$0xf0]  ;;  %v2642_v52 = vor.u32 %v3209_v44, %v2641_v43  ;;  %1673 = vmatpush.bf16.msrb.mxu2 %v2914_v42 }
  0x2b   :  { %v2897_v48 = vld [vmem:[#allocation2 + $0x6c0] sm:$0xf]  ;;  %v3273_v49 = vld [vmem:[#allocation2 + $0x6cc] sm:$0xf0]  ;;  %v2770_v55 = vor.u32 %v3241_v47, %v2769_v45  ;;  %1686 = vmatpush.bf16.msrb.mxu3 %v3042_v46 }
  0x2c   :  { %v3025_v50 = vld [vmem:[#allocation2 + $0x7c0] sm:$0xf]  ;;  %v3305_v51 = vld [vmem:[#allocation2 + $0x7cc] sm:$0xf0]  ;;  %v2898_v56 = vor.u32 %v3273_v49, %v2897_v48  ;;  %1648 = vmatpush.bf16.msrb.mxu0 %v2642_v52 }
  0x2d   :  { %v2625_v53 = vld [vmem:[#allocation2 + $0x4a0] sm:$0xf]  ;;  %v3205_v54 = vld [vmem:[#allocation2 + $0x4ac] sm:$0xf0]  ;;  %v3026_v60 = vor.u32 %v3305_v51, %v3025_v50  ;;  %1661 = vmatpush.bf16.msrb.mxu1 %v2770_v55 }
  0x2e   :  { %v2753_v57 = vld [vmem:[#allocation2 + $0x5a0] sm:$0xf]  ;;  %v3237_v58 = vld [vmem:[#allocation2 + $0x5ac] sm:$0xf0]  ;;  %v2626_v1 = vor.u32 %v3205_v54, %v2625_v53  ;;  %1674 = vmatpush.bf16.msrb.mxu2 %v2898_v56 }
  0x2f   :  { %v2881_v61 = vld [vmem:[#allocation2 + $0x6a0] sm:$0xf]  ;;  %v3269_v62 = vld [vmem:[#allocation2 + $0x6ac] sm:$0xf0]  ;;  %v2754_v2 = vor.u32 %v3237_v58, %v2753_v57  ;;  %1687 = vmatpush.bf16.msrb.mxu3 %v3026_v60 }
  0x30   :  { %v3009_v63 = vld [vmem:[#allocation2 + $0x7a0] sm:$0xf]  ;;  %v3301_v0 = vld [vmem:[#allocation2 + $0x7ac] sm:$0xf0]  ;;  %v2882_v3 = vor.u32 %v3269_v62, %v2881_v61  ;;  %1649 = vmatpush.bf16.msrb.mxu0 %v2626_v1  ;;  %v3083_v1 = vld [vmem:[#allocation2 + $0xe4] sm:$0xf] }
  0x31   :  { %v2609_v4 = vld [vmem:[#allocation2 + $0x480] sm:$0xf]  ;;  %v3201_v5 = vld [vmem:[#allocation2 + $0x48c] sm:$0xf0]  ;;  %v3010_v7 = vor.u32 %v3301_v0, %v3009_v63  ;;  %1662 = vmatpush.bf16.msrb.mxu1 %v2754_v2  ;;  %v2147_v2 = vld [vmem:[#allocation2 + $0xf0] sm:$0xf0] }
  0x32   :  { %v2737_v6 = vld [vmem:[#allocation2 + $0x580] sm:$0xf]  ;;  %v3233_v8 = vld [vmem:[#allocation2 + $0x58c] sm:$0xf0]  ;;  %v2610_v14 = vor.u32 %v3201_v5, %v2609_v4  ;;  %1675 = vmatpush.bf16.msrb.mxu2 %v2882_v3  ;;  %v3115_v3 = vld [vmem:[#allocation2 + $0x1e4] sm:$0xf] }
  0x33   :  { %v2865_v9 = vld [vmem:[#allocation2 + $0x680] sm:$0xf]  ;;  %v3265_v10 = vld [vmem:[#allocation2 + $0x68c] sm:$0xf0]  ;;  %v2738_v18 = vor.u32 %v3233_v8, %v2737_v6  ;;  %1688 = vmatpush.bf16.msrb.mxu3 %v3010_v7  ;;  %v2275_v5 = vld [vmem:[#allocation2 + $0x1f0] sm:$0xf0] }
  0x34   :  { %v2993_v11 = vld [vmem:[#allocation2 + $0x780] sm:$0xf]  ;;  %v3297_v12 = vld [vmem:[#allocation2 + $0x78c] sm:$0xf0]  ;;  %v2866_v19 = vor.u32 %v3265_v10, %v2865_v9  ;;  %1650 = vmatpush.bf16.msrb.mxu0 %v2610_v14  ;;  %v3147_v6 = vld [vmem:[#allocation2 + $0x2e4] sm:$0xf]  ;;  %v2278_v14 = vor.u32 %v3115_v3, %v2275_v5 }
  0x35   :  { %v2593_v13 = vld [vmem:[#allocation2 + $0x460] sm:$0xf]  ;;  %v3197_v15 = vld [vmem:[#allocation2 + $0x46c] sm:$0xf0]  ;;  %v2994_v23 = vor.u32 %v3297_v12, %v2993_v11  ;;  %1663 = vmatpush.bf16.msrb.mxu1 %v2738_v18  ;;  %v2403_v7 = vld [vmem:[#allocation2 + $0x2f0] sm:$0xf0] }
  0x36   :  { %v2721_v16 = vld [vmem:[#allocation2 + $0x560] sm:$0xf]  ;;  %v3229_v17 = vld [vmem:[#allocation2 + $0x56c] sm:$0xf0]  ;;  %v2594_v29 = vor.u32 %v3197_v15, %v2593_v13  ;;  %1676 = vmatpush.bf16.msrb.mxu2 %v2866_v19  ;;  %v3179_v10 = vld [vmem:[#allocation2 + $0x3e4] sm:$0xf]  ;;  %v2150_v13 = vor.u32 %v3083_v1, %v2147_v2  ;;  %v2406_v15 = vor.u32 %v3147_v6, %v2403_v7 }
  0x37   :  { %v3377_v20 = vld [vmem:[#allocation1 + $0x12] sm:$0xff]  ;;  %v3381_v22 = vld [vmem:[#allocation1 + $0x1b] sm:$0xff]  ;;  %v2849_v24 = vld [vmem:[#allocation2 + $0x660] sm:$0xf]  ;;  %v2722_v30 = vor.u32 %v3229_v17, %v2721_v16  ;;  %1689 = vmatpush.bf16.msrb.mxu3 %v2994_v23 }
  0x38   :  { %v3261_v25 = vld [vmem:[#allocation2 + $0x66c] sm:$0xf0]  ;;  %1629 = vmatmul.bf16.vlgmr.msra.gmra.mxu2 %v3377_v20  ;;  %v3384_v26 = vld [vmem:[#allocation1 + $0x9] sm:$0xff]  ;;  %1642 = vmatmul.bf16.vlgmr.msra.gmra.mxu3 %v3381_v22  ;;  %v2531_v11 = vld [vmem:[#allocation2 + $0x3f0] sm:$0xf0] }
  0x39   :  { %v2977_v27 = vld [vmem:[#allocation2 + $0x760] sm:$0xf]  ;;  %v3293_v28 = vld [vmem:[#allocation2 + $0x76c] sm:$0xf0]  ;;  %1616 = vmatmul.bf16.vlgmr.msra.gmra.mxu1 %v3384_v26  ;;  %v2850_v31 = vor.u32 %v3261_v25, %v2849_v24  ;;  %1651 = vmatpush.bf16.msrb.mxu0 %v2594_v29  ;;  %v3079_v16 = vld [vmem:[#allocation2 + $0xc4] sm:$0xf]  ;;  %v2534_v19 = vor.u32 %v3179_v10, %v2531_v11 }
  0x3a   :  { %v2577_v32 = vld [vmem:[#allocation2 + $0x440] sm:$0xf]  ;;  %v3193_v33 = vld [vmem:[#allocation2 + $0x44c] sm:$0xf0]  ;;  %v2978_v35 = vor.u32 %v3293_v28, %v2977_v27  ;;  %1664 = vmatpush.bf16.msrb.mxu1 %v2722_v30  ;;  %v2131_v17 = vld [vmem:[#allocation2 + $0xd0] sm:$0xf0] }
  0x3b   :  { %v2705_v34 = vld [vmem:[#allocation2 + $0x540] sm:$0xf]  ;;  %v3225_v36 = vld [vmem:[#allocation2 + $0x54c] sm:$0xf0]  ;;  %v2578_v41 = vor.u32 %v3193_v33, %v2577_v32  ;;  %1677 = vmatpush.bf16.msrb.mxu2 %v2850_v31  ;;  %v3111_v18 = vld [vmem:[#allocation2 + $0x1c4] sm:$0xf]  ;;  %v2134_v30 = vor.u32 %v3079_v16, %v2131_v17 }
  0x3c   :  { %v2833_v37 = vld [vmem:[#allocation2 + $0x640] sm:$0xf]  ;;  %v3257_v38 = vld [vmem:[#allocation2 + $0x64c] sm:$0xf0]  ;;  %v2706_v42 = vor.u32 %v3225_v36, %v2705_v34  ;;  %1690 = vmatpush.bf16.msrb.mxu3 %v2978_v35  ;;  %v2259_v23 = vld [vmem:[#allocation2 + $0x1d0] sm:$0xf0] }
  0x3d   :  { %v2961_v39 = vld [vmem:[#allocation2 + $0x740] sm:$0xf]  ;;  %v3289_v40 = vld [vmem:[#allocation2 + $0x74c] sm:$0xf0]  ;;  %v2834_v43 = vor.u32 %v3257_v38, %v2833_v37  ;;  %1652 = vmatpush.bf16.msrb.mxu0 %v2578_v41  ;;  %v3143_v24 = vld [vmem:[#allocation2 + $0x2c4] sm:$0xf]  ;;  %v2262_v34 = vor.u32 %v3111_v18, %v2259_v23 }
  0x3e   :  { %v2561_v44 = vld [vmem:[#allocation2 + $0x420] sm:$0xf]  ;;  %v3189_v45 = vld [vmem:[#allocation2 + $0x42c] sm:$0xf0]  ;;  %v2962_v47 = vor.u32 %v3289_v40, %v2961_v39  ;;  %1665 = vmatpush.bf16.msrb.mxu1 %v2706_v42  ;;  %v2387_v25 = vld [vmem:[#allocation2 + $0x2d0] sm:$0xf0] }
  0x3f   :  { %v2689_v46 = vld [vmem:[#allocation2 + $0x520] sm:$0xf]  ;;  %v3221_v48 = vld [vmem:[#allocation2 + $0x52c] sm:$0xf0]  ;;  %v2562_v53 = vor.u32 %v3189_v45, %v2561_v44  ;;  %1678 = vmatpush.bf16.msrb.mxu2 %v2834_v43  ;;  %v3175_v27 = vld [vmem:[#allocation2 + $0x3c4] sm:$0xf]  ;;  %v2390_v35 = vor.u32 %v3143_v24, %v2387_v25 }
  0x40   :  { %v2817_v49 = vld [vmem:[#allocation2 + $0x620] sm:$0xf]  ;;  %v3253_v50 = vld [vmem:[#allocation2 + $0x62c] sm:$0xf0]  ;;  %v2690_v56 = vor.u32 %v3221_v48, %v2689_v46  ;;  %1691 = vmatpush.bf16.msrb.mxu3 %v2962_v47  ;;  %v2515_v28 = vld [vmem:[#allocation2 + $0x3d0] sm:$0xf0] }
  0x41   :  { %v2945_v51 = vld [vmem:[#allocation2 + $0x720] sm:$0xf]  ;;  %v3285_v52 = vld [vmem:[#allocation2 + $0x72c] sm:$0xf0]  ;;  %v2818_v57 = vor.u32 %v3253_v50, %v2817_v49  ;;  %1653 = vmatpush.bf16.msrb.mxu0 %v2562_v53  ;;  %v3075_v31 = vld [vmem:[#allocation2 + $0xa4] sm:$0xf]  ;;  %v2518_v39 = vor.u32 %v3175_v27, %v2515_v28 }
  0x42   :  { %v2545_v54 = vld [vmem:[#allocation2 + $0x400] sm:$0xf]  ;;  %v3185_v55 = vld [vmem:[#allocation2 + $0x40c] sm:$0xf0]  ;;  %v2946_v61 = vor.u32 %v3285_v52, %v2945_v51  ;;  %1666 = vmatpush.bf16.msrb.mxu1 %v2690_v56  ;;  %v3393_v33 = vld [vmem:[#allocation1 + $0x3f] sm:$0xff] }
  0x43   :  { %v2673_v58 = vld [vmem:[#allocation2 + $0x500] sm:$0xf]  ;;  %v3217_v59 = vld [vmem:[#allocation2 + $0x50c] sm:$0xf0]  ;;  %v2546_v4 = vor.u32 %v3185_v55, %v2545_v54  ;;  %1679 = vmatpush.bf16.msrb.mxu2 %v2818_v57  ;;  %v2115_v36 = vld [vmem:[#allocation2 + $0xb0] sm:$0xf0] }
  0x44   :  { %v2801_v60 = vld [vmem:[#allocation2 + $0x600] sm:$0xf]  ;;  %v3249_v62 = vld [vmem:[#allocation2 + $0x60c] sm:$0xf0]  ;;  %v2674_v8 = vor.u32 %v3217_v59, %v2673_v58  ;;  %1692 = vmatpush.bf16.msrb.mxu3 %v2946_v61  ;;  %v3107_v37 = vld [vmem:[#allocation2 + $0x1a4] sm:$0xf]  ;;  %v2118_v45 = vor.u32 %v3075_v31, %v2115_v36 }
  0x45   :  { %v2929_v63 = vld [vmem:[#allocation2 + $0x700] sm:$0xf]  ;;  %v3281_v0 = vld [vmem:[#allocation2 + $0x70c] sm:$0xf0]  ;;  %v2802_v9 = vor.u32 %v3249_v62, %v2801_v60  ;;  %1654 = vmatpush.bf16.msrb.mxu0 %v2546_v4  ;;  %v3395_v38 = vld [vmem:[#allocation1 + $0x2d] sm:$0xff] }
  0x46   :  { %v2930_v12 = vor.u32 %v3281_v0, %v2929_v63  ;;  %1667 = vmatpush.bf16.msrb.mxu1 %v2674_v8  ;;  %v3389_v29 = vld [vmem:[#allocation1 + $0x36] sm:$0xff]  ;;  %v3391_v32 = vld [vmem:[#allocation1 + $0x24] sm:$0xff]  ;;  %v3139_v41 = vld [vmem:[#allocation2 + $0x2a4] sm:$0xf] }
  0x47   :  { %1680 = vmatpush.bf16.msrb.mxu2 %v2802_v9  ;;  %v2243_v40 = vld [vmem:[#allocation2 + $0x1b0] sm:$0xf0]  ;;  %v3171_v43 = vld [vmem:[#allocation2 + $0x3a4] sm:$0xf] }
  0x48   :  { %1693 = vmatpush.bf16.msrb.mxu3 %v2930_v12  ;;  %v2371_v42 = vld [vmem:[#allocation2 + $0x2b0] sm:$0xf0]  ;;  %1655 = vmatmul.bf16.vlgmr.msrb.gmra.mxu0 %v3391_v32  ;;  %v2246_v46 = vor.u32 %v3107_v37, %v2243_v40  ;;  %v3071_v48 = vld [vmem:[#allocation2 + $0x84] sm:$0xf] }
  0x49   :  { %1699 = vmatpush.bf16.msra.mxu0 %v2150_v13  ;;  %v2499_v44 = vld [vmem:[#allocation2 + $0x3b0] sm:$0xf0]  ;;  %1668 = vmatmul.bf16.vlgmr.msrb.gmra.mxu1 %v3395_v38  ;;  %v2374_v47 = vor.u32 %v3139_v41, %v2371_v42  ;;  %v3103_v50 = vld [vmem:[#allocation2 + $0x184] sm:$0xf] }
  0x4a   :  { %1712 = vmatpush.bf16.msra.mxu1 %v2278_v14  ;;  %1681 = vmatmul.bf16.vlgmr.msrb.gmra.mxu2 %v3389_v29  ;;  %v2099_v49 = vld [vmem:[#allocation2 + $0x90] sm:$0xf0]  ;;  %v2502_v51 = vor.u32 %v3171_v43, %v2499_v44  ;;  %v3135_v53 = vld [vmem:[#allocation2 + $0x284] sm:$0xf] }
  0x4b   :  { %1725 = vmatpush.bf16.msra.mxu2 %v2406_v15  ;;  %1694 = vmatmul.bf16.vlgmr.msrb.gmra.mxu3 %v3393_v33  ;;  %v2227_v52 = vld [vmem:[#allocation2 + $0x190] sm:$0xf0]  ;;  %v3167_v55 = vld [vmem:[#allocation2 + $0x384] sm:$0xf]  ;;  %v2102_v57 = vor.u32 %v3071_v48, %v2099_v49 }
  0x4c   :  { %1738 = vmatpush.bf16.msra.mxu3 %v2534_v19  ;;  %v2355_v54 = vld [vmem:[#allocation2 + $0x290] sm:$0xf0]  ;;  %v2230_v58 = vor.u32 %v3103_v50, %v2227_v52  ;;  %v3067_v60 = vld [vmem:[#allocation2 + $0x64] sm:$0xf] }
  0x4d   :  { %1700 = vmatpush.bf16.msra.mxu0 %v2134_v30  ;;  %v2483_v56 = vld [vmem:[#allocation2 + $0x390] sm:$0xf0]  ;;  %v2358_v59 = vor.u32 %v3135_v53, %v2355_v54  ;;  %v3099_v62 = vld [vmem:[#allocation2 + $0x164] sm:$0xf] }
  0x4e   :  { %1713 = vmatpush.bf16.msra.mxu1 %v2262_v34  ;;  %v2083_v61 = vld [vmem:[#allocation2 + $0x70] sm:$0xf0]  ;;  %v2486_v63 = vor.u32 %v3167_v55, %v2483_v56  ;;  %v3131_v1 = vld [vmem:[#allocation2 + $0x264] sm:$0xf] }
  0x4f   :  { %1726 = vmatpush.bf16.msra.mxu2 %v2390_v35  ;;  %v2211_v0 = vld [vmem:[#allocation2 + $0x170] sm:$0xf0]  ;;  %v3163_v3 = vld [vmem:[#allocation2 + $0x364] sm:$0xf]  ;;  %v2086_v5 = vor.u32 %v3067_v60, %v2083_v61 }
  0x50   :  { %1739 = vmatpush.bf16.msra.mxu3 %v2518_v39  ;;  %v2339_v2 = vld [vmem:[#allocation2 + $0x270] sm:$0xf0]  ;;  %v2214_v6 = vor.u32 %v3099_v62, %v2211_v0  ;;  %v3063_v8 = vld [vmem:[#allocation2 + $0x44] sm:$0xf] }
  0x51   :  { %1701 = vmatpush.bf16.msra.mxu0 %v2118_v45  ;;  %v2467_v4 = vld [vmem:[#allocation2 + $0x370] sm:$0xf0]  ;;  %v2342_v7 = vor.u32 %v3131_v1, %v2339_v2  ;;  %v3095_v10 = vld [vmem:[#allocation2 + $0x144] sm:$0xf] }
  0x52   :  { %1714 = vmatpush.bf16.msra.mxu1 %v2246_v46  ;;  %v2067_v9 = vld [vmem:[#allocation2 + $0x50] sm:$0xf0]  ;;  %v2470_v11 = vor.u32 %v3163_v3, %v2467_v4  ;;  %v3127_v13 = vld [vmem:[#allocation2 + $0x244] sm:$0xf] }
  0x53   :  { %1727 = vmatpush.bf16.msra.mxu2 %v2374_v47  ;;  %v2195_v12 = vld [vmem:[#allocation2 + $0x150] sm:$0xf0]  ;;  %v3159_v15 = vld [vmem:[#allocation2 + $0x344] sm:$0xf]  ;;  %v2070_v17 = vor.u32 %v3063_v8, %v2067_v9 }
  0x54   :  { %1740 = vmatpush.bf16.msra.mxu3 %v2502_v51  ;;  %v2323_v14 = vld [vmem:[#allocation2 + $0x250] sm:$0xf0]  ;;  %v2198_v18 = vor.u32 %v3095_v10, %v2195_v12  ;;  %v3059_v23 = vld [vmem:[#allocation2 + $0x24] sm:$0xf] }
  0x55   :  { %1702 = vmatpush.bf16.msra.mxu0 %v2102_v57  ;;  %v2451_v16 = vld [vmem:[#allocation2 + $0x350] sm:$0xf0]  ;;  %v2326_v19 = vor.u32 %v3127_v13, %v2323_v14  ;;  %v3091_v25 = vld [vmem:[#allocation2 + $0x124] sm:$0xf] }
  0x56   :  { %1715 = vmatpush.bf16.msra.mxu1 %v2230_v58  ;;  %v2051_v24 = vld [vmem:[#allocation2 + $0x30] sm:$0xf0]  ;;  %v2454_v27 = vor.u32 %v3159_v15, %v2451_v16  ;;  %v3123_v30 = vld [vmem:[#allocation2 + $0x224] sm:$0xf] }
  0x57   :  { %1728 = vmatpush.bf16.msra.mxu2 %v2358_v59  ;;  %v2179_v28 = vld [vmem:[#allocation2 + $0x130] sm:$0xf0]  ;;  %v3155_v34 = vld [vmem:[#allocation2 + $0x324] sm:$0xf]  ;;  %v2054_v36 = vor.u32 %v3059_v23, %v2051_v24 }
  0x58   :  { %1741 = vmatpush.bf16.msra.mxu3 %v2486_v63  ;;  %v2307_v31 = vld [vmem:[#allocation2 + $0x230] sm:$0xf0]  ;;  %v3055_v37 = vld [vmem:[#allocation2 + $0x4] sm:$0xf]  ;;  %v2182_v40 = vor.u32 %v3091_v25, %v2179_v28 }
  0x59   :  { %1703 = vmatpush.bf16.msra.mxu0 %v2086_v5  ;;  %v2435_v35 = vld [vmem:[#allocation2 + $0x330] sm:$0xf0]  ;;  %v2310_v41 = vor.u32 %v3123_v30, %v2307_v31  ;;  %v3087_v42 = vld [vmem:[#allocation2 + $0x104] sm:$0xf] }
  0x5a   :  { %1716 = vmatpush.bf16.msra.mxu1 %v2214_v6  ;;  %v2035_v39 = vld [vmem:[#allocation2 + $0x10] sm:$0xf0]  ;;  %v3119_v44 = vld [vmem:[#allocation2 + $0x204] sm:$0xf]  ;;  %v2438_v45 = vor.u32 %v3155_v34, %v2435_v35 }
  0x5b   :  { %1729 = vmatpush.bf16.msra.mxu2 %v2342_v7  ;;  %v2163_v43 = vld [vmem:[#allocation2 + $0x110] sm:$0xf0]  ;;  %v3151_v47 = vld [vmem:[#allocation2 + $0x304] sm:$0xf]  ;;  %v2038_v52 = vor.u32 %v3055_v37, %v2035_v39 }
  0x5c   :  { %1742 = vmatpush.bf16.msra.mxu3 %v2470_v11  ;;  %v2291_v46 = vld [vmem:[#allocation2 + $0x210] sm:$0xf0]  ;;  %v3211_v49 = vld [vmem:[#allocation2 + $0x4e4] sm:$0xf]  ;;  %v2166_v56 = vor.u32 %v3087_v42, %v2163_v43 }
  0x5d   :  { %1704 = vmatpush.bf16.msra.mxu0 %v2070_v17  ;;  %v2419_v48 = vld [vmem:[#allocation2 + $0x310] sm:$0xf0]  ;;  %v3243_v51 = vld [vmem:[#allocation2 + $0x5e4] sm:$0xf]  ;;  %v2294_v57 = vor.u32 %v3119_v44, %v2291_v46 }
  0x5e   :  { %1717 = vmatpush.bf16.msra.mxu1 %v2198_v18  ;;  %v2659_v50 = vld [vmem:[#allocation2 + $0x4f0] sm:$0xf0]  ;;  %v3275_v54 = vld [vmem:[#allocation2 + $0x6e4] sm:$0xf]  ;;  %v2422_v60 = vor.u32 %v3151_v47, %v2419_v48 }
  0x5f   :  { %1730 = vmatpush.bf16.msra.mxu2 %v2326_v19  ;;  %v2787_v53 = vld [vmem:[#allocation2 + $0x5f0] sm:$0xf0]  ;;  %v3307_v58 = vld [vmem:[#allocation2 + $0x7e4] sm:$0xf]  ;;  %v2662_v61 = vor.u32 %v3211_v49, %v2659_v50 }
  0x60   :  { %1743 = vmatpush.bf16.msra.mxu3 %v2454_v27  ;;  %v2915_v55 = vld [vmem:[#allocation2 + $0x6f0] sm:$0xf0]  ;;  %v2790_v62 = vor.u32 %v3243_v51, %v2787_v53  ;;  %v3207_v0 = vld [vmem:[#allocation2 + $0x4c4] sm:$0xf] }
  0x61   :  { %1705 = vmatpush.bf16.msra.mxu0 %v2054_v36  ;;  %v3043_v59 = vld [vmem:[#allocation2 + $0x7f0] sm:$0xf0]  ;;  %v2918_v63 = vor.u32 %v3275_v54, %v2915_v55  ;;  %v3239_v2 = vld [vmem:[#allocation2 + $0x5c4] sm:$0xf] }
  0x62   :  { %1718 = vmatpush.bf16.msra.mxu1 %v2182_v40  ;;  %v2643_v1 = vld [vmem:[#allocation2 + $0x4d0] sm:$0xf0]  ;;  %v3046_v3 = vor.u32 %v3307_v58, %v3043_v59  ;;  %v3271_v5 = vld [vmem:[#allocation2 + $0x6c4] sm:$0xf] }
  0x63   :  { %1731 = vmatpush.bf16.msra.mxu2 %v2310_v41  ;;  %v2771_v4 = vld [vmem:[#allocation2 + $0x5d0] sm:$0xf0]  ;;  %v3303_v7 = vld [vmem:[#allocation2 + $0x7c4] sm:$0xf]  ;;  %v2646_v9 = vor.u32 %v3207_v0, %v2643_v1 }
  0x64   :  { %1744 = vmatpush.bf16.msra.mxu3 %v2438_v45  ;;  %v2899_v6 = vld [vmem:[#allocation2 + $0x6d0] sm:$0xf0]  ;;  %v2774_v10 = vor.u32 %v3239_v2, %v2771_v4  ;;  %v3203_v12 = vld [vmem:[#allocation2 + $0x4a4] sm:$0xf] }
  0x65   :  { %1706 = vmatpush.bf16.msra.mxu0 %v2038_v52  ;;  %v3027_v8 = vld [vmem:[#allocation2 + $0x7d0] sm:$0xf0]  ;;  %v2902_v11 = vor.u32 %v3271_v5, %v2899_v6  ;;  %v3235_v14 = vld [vmem:[#allocation2 + $0x5a4] sm:$0xf] }
  0x66   :  { %1719 = vmatpush.bf16.msra.mxu1 %v2166_v56  ;;  %v2627_v13 = vld [vmem:[#allocation2 + $0x4b0] sm:$0xf0]  ;;  %v3030_v15 = vor.u32 %v3303_v7, %v3027_v8  ;;  %v3267_v17 = vld [vmem:[#allocation2 + $0x6a4] sm:$0xf] }
  0x67   :  { %1732 = vmatpush.bf16.msra.mxu2 %v2294_v57  ;;  %v2755_v16 = vld [vmem:[#allocation2 + $0x5b0] sm:$0xf0]  ;;  %v3299_v19 = vld [vmem:[#allocation2 + $0x7a4] sm:$0xf]  ;;  %v2630_v24 = vor.u32 %v3203_v12, %v2627_v13 }
  0x68   :  { %1745 = vmatpush.bf16.msra.mxu3 %v2422_v60  ;;  %v2883_v18 = vld [vmem:[#allocation2 + $0x6b0] sm:$0xf0]  ;;  %1707 = vmatmul.bf16.vlgmr.msra.gmra.mxu0 %v3379_v21  ;;  %v2758_v25 = vor.u32 %v3235_v14, %v2755_v16  ;;  %v3199_v28 = vld [vmem:[#allocation2 + $0x484] sm:$0xf] }
  0x69   :  { %1751 = vmatpush.bf16.msrb.mxu0 %v2662_v61  ;;  %v3011_v23 = vld [vmem:[#allocation2 + $0x7b0] sm:$0xf0]  ;;  %1720 = vmatmul.bf16.vlgmr.msra.gmra.mxu1 %v3384_v26  ;;  %v2886_v27 = vor.u32 %v3267_v17, %v2883_v18  ;;  %v3231_v31 = vld [vmem:[#allocation2 + $0x584] sm:$0xf] }
  0x6a   :  { %1764 = vmatpush.bf16.msrb.mxu1 %v2790_v62  ;;  %1733 = vmatmul.bf16.vlgmr.msra.gmra.mxu2 %v3377_v20  ;;  %v2611_v30 = vld [vmem:[#allocation2 + $0x490] sm:$0xf0]  ;;  %v3014_v34 = vor.u32 %v3299_v19, %v3011_v23  ;;  %v3263_v36 = vld [vmem:[#allocation2 + $0x684] sm:$0xf] }
  0x6b   :  { %1777 = vmatpush.bf16.msrb.mxu2 %v2918_v63  ;;  %1746 = vmatmul.bf16.vlgmr.msra.gmra.mxu3 %v3381_v22  ;;  %v2739_v35 = vld [vmem:[#allocation2 + $0x590] sm:$0xf0]  ;;  %v3295_v39 = vld [vmem:[#allocation2 + $0x784] sm:$0xf]  ;;  %v2614_v41 = vor.u32 %v3199_v28, %v2611_v30  ;;  %v2153_v30 = vld [vmem:[#allocation2 + $0xe8] sm:$0xf] }
  0x6c   :  { %1790 = vmatpush.bf16.msrb.mxu3 %v3046_v3  ;;  %v2867_v37 = vld [vmem:[#allocation2 + $0x690] sm:$0xf0]  ;;  %v2742_v42 = vor.u32 %v3231_v31, %v2739_v35  ;;  %v3195_v44 = vld [vmem:[#allocation2 + $0x464] sm:$0xf]  ;;  %v3086_v31 = vld [vmem:[#allocation2 + $0xf4] sm:$0xf0] }
  0x6d   :  { %1752 = vmatpush.bf16.msrb.mxu0 %v2646_v9  ;;  %v2995_v40 = vld [vmem:[#allocation2 + $0x790] sm:$0xf0]  ;;  %v2870_v43 = vor.u32 %v3263_v36, %v2867_v37  ;;  %v3227_v46 = vld [vmem:[#allocation2 + $0x564] sm:$0xf]  ;;  %v3118_v36 = vld [vmem:[#allocation2 + $0x1f4] sm:$0xf0] }
  0x6e   :  { %1765 = vmatpush.bf16.msrb.mxu1 %v2774_v10  ;;  %v2595_v45 = vld [vmem:[#allocation2 + $0x470] sm:$0xf0]  ;;  %v2998_v47 = vor.u32 %v3295_v39, %v2995_v40  ;;  %v3259_v49 = vld [vmem:[#allocation2 + $0x664] sm:$0xf]  ;;  %v2409_v37 = vld [vmem:[#allocation2 + $0x2e8] sm:$0xf] }
  0x6f   :  { %1778 = vmatpush.bf16.msrb.mxu2 %v2902_v11  ;;  %v2723_v48 = vld [vmem:[#allocation2 + $0x570] sm:$0xf0]  ;;  %v3291_v51 = vld [vmem:[#allocation2 + $0x764] sm:$0xf]  ;;  %v2598_v53 = vor.u32 %v3195_v44, %v2595_v45  ;;  %v3150_v39 = vld [vmem:[#allocation2 + $0x2f4] sm:$0xf0]  ;;  %v2154_v45 = vor.u32 %v3086_v31, %v2153_v30 }
  0x70   :  { %1791 = vmatpush.bf16.msrb.mxu3 %v3030_v15  ;;  %v2851_v50 = vld [vmem:[#allocation2 + $0x670] sm:$0xf0]  ;;  %v2726_v54 = vor.u32 %v3227_v46, %v2723_v48  ;;  %v3191_v56 = vld [vmem:[#allocation2 + $0x444] sm:$0xf]  ;;  %v2137_v48 = vld [vmem:[#allocation2 + $0xc8] sm:$0xf] }
  0x71   :  { %1753 = vmatpush.bf16.msrb.mxu0 %v2630_v24  ;;  %v2979_v52 = vld [vmem:[#allocation2 + $0x770] sm:$0xf0]  ;;  %v2854_v55 = vor.u32 %v3259_v49, %v2851_v50  ;;  %v3223_v58 = vld [vmem:[#allocation2 + $0x544] sm:$0xf]  ;;  %v3082_v49 = vld [vmem:[#allocation2 + $0xd4] sm:$0xf0] }
  0x72   :  { %1766 = vmatpush.bf16.msrb.mxu1 %v2758_v25  ;;  %v2579_v57 = vld [vmem:[#allocation2 + $0x450] sm:$0xf0]  ;;  %v2982_v59 = vor.u32 %v3291_v51, %v2979_v52  ;;  %v3255_v61 = vld [vmem:[#allocation2 + $0x644] sm:$0xf]  ;;  %v2265_v50 = vld [vmem:[#allocation2 + $0x1c8] sm:$0xf] }
  0x73   :  { %1779 = vmatpush.bf16.msrb.mxu2 %v2886_v27  ;;  %v2707_v60 = vld [vmem:[#allocation2 + $0x550] sm:$0xf0]  ;;  %v3287_v63 = vld [vmem:[#allocation2 + $0x744] sm:$0xf]  ;;  %v2582_v1 = vor.u32 %v3191_v56, %v2579_v57  ;;  %v3114_v52 = vld [vmem:[#allocation2 + $0x1d4] sm:$0xf0]  ;;  %v2138_v57 = vor.u32 %v3082_v49, %v2137_v48 }
  0x74   :  { %1792 = vmatpush.bf16.msrb.mxu3 %v3014_v34  ;;  %v2835_v62 = vld [vmem:[#allocation2 + $0x650] sm:$0xf0]  ;;  %v2710_v2 = vor.u32 %v3223_v58, %v2707_v60  ;;  %v3187_v4 = vld [vmem:[#allocation2 + $0x424] sm:$0xf]  ;;  %v2281_v34 = vld [vmem:[#allocation2 + $0x1e8] sm:$0xf]  ;;  %v2266_v58 = vor.u32 %v3114_v52, %v2265_v50 }
  0x75   :  { %1754 = vmatpush.bf16.msrb.mxu0 %v2614_v41  ;;  %v2963_v0 = vld [vmem:[#allocation2 + $0x750] sm:$0xf0]  ;;  %v2838_v3 = vor.u32 %v3255_v61, %v2835_v62  ;;  %v3219_v6 = vld [vmem:[#allocation2 + $0x524] sm:$0xf]  ;;  %v2282_v46 = vor.u32 %v3118_v36, %v2281_v34  ;;  %v3178_v56 = vld [vmem:[#allocation2 + $0x3d4] sm:$0xf0] }
  0x76   :  { %1767 = vmatpush.bf16.msrb.mxu1 %v2742_v42  ;;  %v2563_v5 = vld [vmem:[#allocation2 + $0x430] sm:$0xf0]  ;;  %v2966_v7 = vor.u32 %v3287_v63, %v2963_v0  ;;  %v3251_v9 = vld [vmem:[#allocation2 + $0x624] sm:$0xf]  ;;  %v2537_v42 = vld [vmem:[#allocation2 + $0x3e8] sm:$0xf] }
  0x77   :  { %1780 = vmatpush.bf16.msrb.mxu2 %v2870_v43  ;;  %v2691_v8 = vld [vmem:[#allocation2 + $0x530] sm:$0xf0]  ;;  %v3283_v11 = vld [vmem:[#allocation2 + $0x724] sm:$0xf]  ;;  %v2566_v13 = vor.u32 %v3187_v4, %v2563_v5  ;;  %v3182_v43 = vld [vmem:[#allocation2 + $0x3f4] sm:$0xf0] }
  0x78   :  { %1793 = vmatpush.bf16.msrb.mxu3 %v2998_v47  ;;  %v2819_v10 = vld [vmem:[#allocation2 + $0x630] sm:$0xf0]  ;;  %v3183_v14 = vld [vmem:[#allocation2 + $0x404] sm:$0xf]  ;;  %v2694_v16 = vor.u32 %v3219_v6, %v2691_v8  ;;  %v2410_v47 = vor.u32 %v3150_v39, %v2409_v37  ;;  %v2538_v51 = vor.u32 %v3182_v43, %v2537_v42  ;;  %v2121_v60 = vld [vmem:[#allocation2 + $0xa8] sm:$0xf] }
  0x79   :  { %1755 = vmatpush.bf16.msrb.mxu0 %v2598_v53  ;;  %v2947_v12 = vld [vmem:[#allocation2 + $0x730] sm:$0xf0]  ;;  %v2822_v17 = vor.u32 %v3251_v9, %v2819_v10  ;;  %v3215_v18 = vld [vmem:[#allocation2 + $0x504] sm:$0xf]  ;;  %v2393_v53 = vld [vmem:[#allocation2 + $0x2c8] sm:$0xf] }
  0x7a   :  { %1768 = vmatpush.bf16.msrb.mxu1 %v2726_v54  ;;  %v2547_v15 = vld [vmem:[#allocation2 + $0x410] sm:$0xf0]  ;;  %v3247_v23 = vld [vmem:[#allocation2 + $0x604] sm:$0xf]  ;;  %v2950_v24 = vor.u32 %v3283_v11, %v2947_v12  ;;  %v3146_v54 = vld [vmem:[#allocation2 + $0x2d4] sm:$0xf0] }
  0x7b   :  { %1781 = vmatpush.bf16.msrb.mxu2 %v2854_v55  ;;  %v2675_v19 = vld [vmem:[#allocation2 + $0x510] sm:$0xf0]  ;;  %v3279_v27 = vld [vmem:[#allocation2 + $0x704] sm:$0xf]  ;;  %v2550_v35 = vor.u32 %v3183_v14, %v2547_v15  ;;  %v2521_v55 = vld [vmem:[#allocation2 + $0x3c8] sm:$0xf] }
  0x7c   :  { %1794 = vmatpush.bf16.msrb.mxu3 %v2982_v59  ;;  %v2803_v25 = vld [vmem:[#allocation2 + $0x610] sm:$0xf0]  ;;  %v2678_v40 = vor.u32 %v3215_v18, %v2675_v19  ;;  %v2394_v59 = vor.u32 %v3146_v54, %v2393_v53  ;;  %v3078_v61 = vld [vmem:[#allocation2 + $0xb4] sm:$0xf0]  ;;  %v2249_v62 = vld [vmem:[#allocation2 + $0x1a8] sm:$0xf]  ;;  %v2522_v63 = vor.u32 %v3178_v56, %v2521_v55 }
  0x7d   :  { %1756 = vmatpush.bf16.msrb.mxu0 %v2582_v1  ;;  %v2931_v28 = vld [vmem:[#allocation2 + $0x710] sm:$0xf0]  ;;  %v2806_v41 = vor.u32 %v3247_v23, %v2803_v25  ;;  %v3110_v0 = vld [vmem:[#allocation2 + $0x1b4] sm:$0xf0]  ;;  %v2377_v1 = vld [vmem:[#allocation2 + $0x2a8] sm:$0xf]  ;;  %v2122_v5 = vor.u32 %v3078_v61, %v2121_v60 }
  0x7e   :  { %1769 = vmatpush.bf16.msrb.mxu1 %v2710_v2  ;;  %v2934_v44 = vor.u32 %v3279_v27, %v2931_v28  ;;  %v3142_v2 = vld [vmem:[#allocation2 + $0x2b4] sm:$0xf0]  ;;  %v2250_v6 = vor.u32 %v3110_v0, %v2249_v62  ;;  %v2105_v8 = vld [vmem:[#allocation2 + $0x88] sm:$0xf] }
  0x7f   :  { %1782 = vmatpush.bf16.msrb.mxu2 %v2838_v3  ;;  %v2505_v3 = vld [vmem:[#allocation2 + $0x3a8] sm:$0xf]  ;;  %v3174_v4 = vld [vmem:[#allocation2 + $0x3b4] sm:$0xf0] }
  0x80   :  { %1795 = vmatpush.bf16.msrb.mxu3 %v2966_v7  ;;  %v2378_v7 = vor.u32 %v3142_v2, %v2377_v1  ;;  %v2233_v9 = vld [vmem:[#allocation2 + $0x188] sm:$0xf]  ;;  %v2506_v10 = vor.u32 %v3174_v4, %v2505_v3  ;;  %v3106_v11 = vld [vmem:[#allocation2 + $0x194] sm:$0xf0] }
  0x81   :  { %1757 = vmatpush.bf16.msrb.mxu0 %v2566_v13  ;;  %v2361_v12 = vld [vmem:[#allocation2 + $0x288] sm:$0xf]  ;;  %v3102_v23 = vld [vmem:[#allocation2 + $0x174] sm:$0xf0] }
  0x82   :  { %1770 = vmatpush.bf16.msrb.mxu1 %v2694_v16  ;;  %v2489_v13 = vld [vmem:[#allocation2 + $0x388] sm:$0xf]  ;;  %v3134_v25 = vld [vmem:[#allocation2 + $0x274] sm:$0xf0] }
  0x83   :  { %1783 = vmatpush.bf16.msrb.mxu2 %v2822_v17  ;;  %v2089_v16 = vld [vmem:[#allocation2 + $0x68] sm:$0xf]  ;;  %v3070_v17 = vld [vmem:[#allocation2 + $0x74] sm:$0xf0] }
  0x84   :  { %1796 = vmatpush.bf16.msrb.mxu3 %v2950_v24  ;;  %v2217_v18 = vld [vmem:[#allocation2 + $0x168] sm:$0xf]  ;;  %v3166_v28 = vld [vmem:[#allocation2 + $0x374] sm:$0xf0]  ;;  %v2090_v30 = vor.u32 %v3070_v17, %v2089_v16 }
  0x85   :  { %1758 = vmatpush.bf16.msrb.mxu0 %v2550_v35  ;;  %v2345_v24 = vld [vmem:[#allocation2 + $0x268] sm:$0xf]  ;;  %v2218_v31 = vor.u32 %v3102_v23, %v2217_v18  ;;  %v3066_v36 = vld [vmem:[#allocation2 + $0x54] sm:$0xf0] }
  0x86   :  { %1771 = vmatpush.bf16.msrb.mxu1 %v2678_v40  ;;  %v2473_v27 = vld [vmem:[#allocation2 + $0x368] sm:$0xf]  ;;  %v2346_v34 = vor.u32 %v3134_v25, %v2345_v24  ;;  %v3098_v40 = vld [vmem:[#allocation2 + $0x154] sm:$0xf0] }
  0x87   :  { %1784 = vmatpush.bf16.msrb.mxu2 %v2806_v41  ;;  %v2073_v35 = vld [vmem:[#allocation2 + $0x48] sm:$0xf]  ;;  %v2474_v39 = vor.u32 %v3166_v28, %v2473_v27  ;;  %v3130_v42 = vld [vmem:[#allocation2 + $0x254] sm:$0xf0] }
  0x88   :  { %1797 = vmatpush.bf16.msrb.mxu3 %v2934_v44  ;;  %1759 = vmatmul.bf16.vlgmr.msrb.gmra.mxu0 %v3391_v32  ;;  %v3138_v32 = vld [vmem:[#allocation2 + $0x294] sm:$0xf0]  ;;  %v2201_v37 = vld [vmem:[#allocation2 + $0x148] sm:$0xf] }
  0x89   :  { %1803 = vmatpush.bf16.msra.mxu0 %v2154_v45  ;;  %1772 = vmatmul.bf16.vlgmr.msrb.gmra.mxu1 %v3395_v38  ;;  %v2234_v38 = vor.u32 %v3106_v11, %v2233_v9  ;;  %v2362_v15 = vor.u32 %v3138_v32, %v2361_v12  ;;  %v2329_v41 = vld [vmem:[#allocation2 + $0x248] sm:$0xf]  ;;  %v3162_v44 = vld [vmem:[#allocation2 + $0x354] sm:$0xf0]  ;;  %v2074_v45 = vor.u32 %v3066_v36, %v2073_v35 }
  0x8a   :  { %1816 = vmatpush.bf16.msra.mxu1 %v2282_v46  ;;  %1785 = vmatmul.bf16.vlgmr.msrb.gmra.mxu2 %v3389_v29  ;;  %v3074_v29 = vld [vmem:[#allocation2 + $0x94] sm:$0xf0]  ;;  %v2457_v43 = vld [vmem:[#allocation2 + $0x348] sm:$0xf]  ;;  %v2202_v46 = vor.u32 %v3098_v40, %v2201_v37 }
  0x8b   :  { %1829 = vmatpush.bf16.msra.mxu2 %v2410_v47  ;;  %1798 = vmatmul.bf16.vlgmr.msrb.gmra.mxu3 %v3393_v33  ;;  %v3170_v33 = vld [vmem:[#allocation2 + $0x394] sm:$0xf0]  ;;  %v2106_v14 = vor.u32 %v3074_v29, %v2105_v8  ;;  %v2330_v47 = vor.u32 %v3130_v42, %v2329_v41  ;;  %v2057_v48 = vld [vmem:[#allocation2 + $0x28] sm:$0xf] }
  0x8c   :  { %1842 = vmatpush.bf16.msra.mxu3 %v2538_v51  ;;  %v2490_v19 = vor.u32 %v3170_v33, %v2489_v13  ;;  %v3062_v49 = vld [vmem:[#allocation2 + $0x34] sm:$0xf0]  ;;  %v2185_v50 = vld [vmem:[#allocation2 + $0x128] sm:$0xf]  ;;  %v2458_v51 = vor.u32 %v3162_v44, %v2457_v43 }
  0x8d   :  { %1804 = vmatpush.bf16.msra.mxu0 %v2138_v57  ;;  %v3094_v52 = vld [vmem:[#allocation2 + $0x134] sm:$0xf0]  ;;  %v2313_v53 = vld [vmem:[#allocation2 + $0x228] sm:$0xf]  ;;  %v2058_v57 = vor.u32 %v3062_v49, %v2057_v48 }
  0x8e   :  { %1817 = vmatpush.bf16.msra.mxu1 %v2266_v58  ;;  %v3126_v54 = vld [vmem:[#allocation2 + $0x234] sm:$0xf0]  ;;  %v2441_v55 = vld [vmem:[#allocation2 + $0x328] sm:$0xf]  ;;  %v2186_v60 = vor.u32 %v3094_v52, %v2185_v50 }
  0x8f   :  { %1830 = vmatpush.bf16.msra.mxu2 %v2394_v59  ;;  %v3158_v56 = vld [vmem:[#allocation2 + $0x334] sm:$0xf0]  ;;  %v2041_v58 = vld [vmem:[#allocation2 + $0x8] sm:$0xf]  ;;  %v2314_v61 = vor.u32 %v3126_v54, %v2313_v53 }
  0x90   :  { %1843 = vmatpush.bf16.msra.mxu3 %v2522_v63  ;;  %v3058_v59 = vld [vmem:[#allocation2 + $0x14] sm:$0xf0]  ;;  %v2169_v62 = vld [vmem:[#allocation2 + $0x108] sm:$0xf]  ;;  %v2442_v1 = vor.u32 %v3158_v56, %v2441_v55 }
  0x91   :  { %1805 = vmatpush.bf16.msra.mxu0 %v2122_v5  ;;  %v3090_v63 = vld [vmem:[#allocation2 + $0x114] sm:$0xf0]  ;;  %v2297_v0 = vld [vmem:[#allocation2 + $0x208] sm:$0xf]  ;;  %v2042_v8 = vor.u32 %v3058_v59, %v2041_v58 }
  0x92   :  { %1818 = vmatpush.bf16.msra.mxu1 %v2250_v6  ;;  %v3122_v2 = vld [vmem:[#allocation2 + $0x214] sm:$0xf0]  ;;  %v2425_v3 = vld [vmem:[#allocation2 + $0x308] sm:$0xf]  ;;  %v2170_v11 = vor.u32 %v3090_v63, %v2169_v62 }
  0x93   :  { %1831 = vmatpush.bf16.msra.mxu2 %v2378_v7  ;;  %v3154_v4 = vld [vmem:[#allocation2 + $0x314] sm:$0xf0]  ;;  %v2665_v5 = vld [vmem:[#allocation2 + $0x4e8] sm:$0xf]  ;;  %v2298_v12 = vor.u32 %v3122_v2, %v2297_v0 }
  0x94   :  { %1844 = vmatpush.bf16.msra.mxu3 %v2506_v10  ;;  %v3214_v6 = vld [vmem:[#allocation2 + $0x4f4] sm:$0xf0]  ;;  %v2793_v7 = vld [vmem:[#allocation2 + $0x5e8] sm:$0xf]  ;;  %v2426_v33 = vor.u32 %v3154_v4, %v2425_v3 }
  0x95   :  { %1806 = vmatpush.bf16.msra.mxu0 %v2106_v14  ;;  %v3246_v29 = vld [vmem:[#allocation2 + $0x5f4] sm:$0xf0]  ;;  %v2921_v9 = vld [vmem:[#allocation2 + $0x6e8] sm:$0xf]  ;;  %v2666_v14 = vor.u32 %v3214_v6, %v2665_v5 }
  0x96   :  { %1819 = vmatpush.bf16.msra.mxu1 %v2234_v38  ;;  %v3278_v10 = vld [vmem:[#allocation2 + $0x6f4] sm:$0xf0]  ;;  %v3049_v32 = vld [vmem:[#allocation2 + $0x7e8] sm:$0xf]  ;;  %v2794_v38 = vor.u32 %v3246_v29, %v2793_v7 }
  0x97   :  { %1832 = vmatpush.bf16.msra.mxu2 %v2362_v15  ;;  %v3310_v13 = vld [vmem:[#allocation2 + $0x7f4] sm:$0xf0]  ;;  %v2922_v15 = vor.u32 %v3278_v10, %v2921_v9  ;;  %v2649_v16 = vld [vmem:[#allocation2 + $0x4c8] sm:$0xf] }
  0x98   :  { %1845 = vmatpush.bf16.msra.mxu3 %v2490_v19  ;;  %v3210_v17 = vld [vmem:[#allocation2 + $0x4d4] sm:$0xf0]  ;;  %v2777_v18 = vld [vmem:[#allocation2 + $0x5c8] sm:$0xf]  ;;  %v3050_v19 = vor.u32 %v3310_v13, %v3049_v32 }
  0x99   :  { %1807 = vmatpush.bf16.msra.mxu0 %v2090_v30  ;;  %v3242_v23 = vld [vmem:[#allocation2 + $0x5d4] sm:$0xf0]  ;;  %v2905_v24 = vld [vmem:[#allocation2 + $0x6c8] sm:$0xf]  ;;  %v2650_v30 = vor.u32 %v3210_v17, %v2649_v16 }
  0x9a   :  { %1820 = vmatpush.bf16.msra.mxu1 %v2218_v31  ;;  %v3274_v25 = vld [vmem:[#allocation2 + $0x6d4] sm:$0xf0]  ;;  %v3033_v27 = vld [vmem:[#allocation2 + $0x7c8] sm:$0xf]  ;;  %v2778_v31 = vor.u32 %v3242_v23, %v2777_v18 }
  0x9b   :  { %1833 = vmatpush.bf16.msra.mxu2 %v2346_v34  ;;  %v3306_v28 = vld [vmem:[#allocation2 + $0x7d4] sm:$0xf0]  ;;  %v2906_v34 = vor.u32 %v3274_v25, %v2905_v24  ;;  %v2633_v35 = vld [vmem:[#allocation2 + $0x4a8] sm:$0xf] }
  0x9c   :  { %1846 = vmatpush.bf16.msra.mxu3 %v2474_v39  ;;  %v3206_v36 = vld [vmem:[#allocation2 + $0x4b4] sm:$0xf0]  ;;  %v2761_v37 = vld [vmem:[#allocation2 + $0x5a8] sm:$0xf]  ;;  %v3034_v39 = vor.u32 %v3306_v28, %v3033_v27 }
  0x9d   :  { %1808 = vmatpush.bf16.msra.mxu0 %v2074_v45  ;;  %v3238_v40 = vld [vmem:[#allocation2 + $0x5b4] sm:$0xf0]  ;;  %v2889_v41 = vld [vmem:[#allocation2 + $0x6a8] sm:$0xf]  ;;  %v2634_v45 = vor.u32 %v3206_v36, %v2633_v35 }
  0x9e   :  { %1821 = vmatpush.bf16.msra.mxu1 %v2202_v46  ;;  %v3270_v42 = vld [vmem:[#allocation2 + $0x6b4] sm:$0xf0]  ;;  %v3017_v43 = vld [vmem:[#allocation2 + $0x7a8] sm:$0xf]  ;;  %v2762_v46 = vor.u32 %v3238_v40, %v2761_v37 }
  0x9f   :  { %1834 = vmatpush.bf16.msra.mxu2 %v2330_v47  ;;  %v3302_v44 = vld [vmem:[#allocation2 + $0x7b4] sm:$0xf0]  ;;  %v2890_v47 = vor.u32 %v3270_v42, %v2889_v41  ;;  %v2617_v48 = vld [vmem:[#allocation2 + $0x488] sm:$0xf] }
  0xa0   :  { %1847 = vmatpush.bf16.msra.mxu3 %v2458_v51  ;;  %v3202_v49 = vld [vmem:[#allocation2 + $0x494] sm:$0xf0]  ;;  %v2745_v50 = vld [vmem:[#allocation2 + $0x588] sm:$0xf]  ;;  %v3018_v51 = vor.u32 %v3302_v44, %v3017_v43 }
  0xa1   :  { %1809 = vmatpush.bf16.msra.mxu0 %v2058_v57  ;;  %v2873_v52 = vld [vmem:[#allocation2 + $0x688] sm:$0xf]  ;;  %v3266_v53 = vld [vmem:[#allocation2 + $0x694] sm:$0xf0] }
  0xa2   :  { %1822 = vmatpush.bf16.msra.mxu1 %v2186_v60  ;;  %v3001_v54 = vld [vmem:[#allocation2 + $0x788] sm:$0xf]  ;;  %v2874_v56 = vor.u32 %v3266_v53, %v2873_v52  ;;  %v3198_v57 = vld [vmem:[#allocation2 + $0x474] sm:$0xf0]  ;;  %v2283_v53 = vld [vmem:[#allocation2 + $0x1f8] sm:$0xf0] }
  0xa3   :  { %1835 = vmatpush.bf16.msra.mxu2 %v2314_v61  ;;  %v2601_v55 = vld [vmem:[#allocation2 + $0x468] sm:$0xf]  ;;  %v3230_v59 = vld [vmem:[#allocation2 + $0x574] sm:$0xf0] }
  0xa4   :  { %1848 = vmatpush.bf16.msra.mxu3 %v2442_v1  ;;  %v2729_v58 = vld [vmem:[#allocation2 + $0x568] sm:$0xf]  ;;  %v3262_v62 = vld [vmem:[#allocation2 + $0x674] sm:$0xf0]  ;;  %v2602_v2 = vor.u32 %v3198_v57, %v2601_v55  ;;  %v3180_v57 = vld [vmem:[#allocation2 + $0x3ec] sm:$0xf] }
  0xa5   :  { %1810 = vmatpush.bf16.msra.mxu0 %v2042_v8  ;;  %v2857_v61 = vld [vmem:[#allocation2 + $0x668] sm:$0xf]  ;;  %v3416_v63 = vld [vmem:[%s3449_s2] sm:$0xf]  ;;  %v2730_v4 = vor.u32 %v3230_v59, %v2729_v58  ;;  %v2539_v58 = vld [vmem:[#allocation2 + $0x3f8] sm:$0xf0] }
  0xa6   :  { %1823 = vmatpush.bf16.msra.mxu1 %v2170_v11  ;;  %v2985_v0 = vld [vmem:[#allocation2 + $0x768] sm:$0xf]  ;;  %v3294_v1 = vld [vmem:[#allocation2 + $0x774] sm:$0xf0]  ;;  %v2858_v5 = vor.u32 %v3262_v62, %v2857_v61  ;;  %v289_v8 = vperm.slane %v3416_v63, 0 }
  0xa7   :  { %1836 = vmatpush.bf16.msra.mxu2 %v2298_v12  ;;  %v2585_v3 = vld [vmem:[#allocation2 + $0x448] sm:$0xf]  ;;  %v3194_v6 = vld [vmem:[#allocation2 + $0x454] sm:$0xf0]  ;;  %v2986_v29 = vor.u32 %v3294_v1, %v2985_v0  ;;  %v3080_v1 = vld [vmem:[#allocation2 + $0xcc] sm:$0xf] }
  0xa8   :  { %1849 = vmatpush.bf16.msra.mxu3 %v2426_v33  ;;  %1811 = vmatmul.bf16.vlgmr.msra.gmra.mxu0 %v3379_v21  ;;  %v3298_v21 = vld [vmem:[#allocation2 + $0x794] sm:$0xf0]  ;;  %v2713_v7 = vld [vmem:[#allocation2 + $0x548] sm:$0xf]  ;;  %v2586_v13 = vor.u32 %v3194_v6, %v2585_v3  ;;  %v1604_v33 = vpop.f32.mrf.mxu0  ;;  %v3112_v3 = vld [vmem:[#allocation2 + $0x1cc] sm:$0xf] }
  0xa9   :  { %1855 = vmatpush.bf16.msrb.mxu0 %v2666_v14  ;;  %1824 = vmatmul.bf16.vlgmr.msra.gmra.mxu1 %v3384_v26  ;;  %v3002_v60 = vor.u32 %v3298_v21, %v3001_v54  ;;  %v3226_v9 = vld [vmem:[#allocation2 + $0x554] sm:$0xf0]  ;;  %v2841_v10 = vld [vmem:[#allocation2 + $0x648] sm:$0xf]  ;;  %v1605_v18 = vadd.f32 %v1604_v33, %v289_v8  ;;  %v3148_v54 = vld [vmem:[#allocation2 + $0x2ec] sm:$0xf] }
  0xaa   :  { %1868 = vmatpush.bf16.msrb.mxu1 %v2794_v38  ;;  %1837 = vmatmul.bf16.vlgmr.msra.gmra.mxu2 %v3377_v20  ;;  %v3234_v20 = vld [vmem:[#allocation2 + $0x594] sm:$0xf0]  ;;  %v2969_v12 = vld [vmem:[#allocation2 + $0x748] sm:$0xf]  ;;  %v2714_v14 = vor.u32 %v3226_v9, %v2713_v7  ;;  %v2411_v21 = vld [vmem:[#allocation2 + $0x2f8] sm:$0xf0] }
  0xab   :  { %1881 = vmatpush.bf16.msrb.mxu2 %v2922_v15  ;;  %1850 = vmatmul.bf16.vlgmr.msra.gmra.mxu3 %v3381_v22  ;;  %v2618_v22 = vor.u32 %v3202_v49, %v2617_v48  ;;  %v2746_v26 = vor.u32 %v3234_v20, %v2745_v50  ;;  %v3258_v11 = vld [vmem:[#allocation2 + $0x654] sm:$0xf0]  ;;  %v2569_v15 = vld [vmem:[#allocation2 + $0x428] sm:$0xf]  ;;  %v3084_v50 = vld [vmem:[#allocation2 + $0xec] sm:$0xf]  ;;  %v2414_v0 = vor.u32 %v3148_v54, %v2411_v21 }
  0xac   :  { %1894 = vmatpush.bf16.msrb.mxu3 %v3050_v19  ;;  %v3290_v32 = vld [vmem:[#allocation2 + $0x754] sm:$0xf0]  ;;  %v2842_v38 = vor.u32 %v3258_v11, %v2841_v10  ;;  %v2697_v17 = vld [vmem:[#allocation2 + $0x528] sm:$0xf]  ;;  %v3116_v20 = vld [vmem:[#allocation2 + $0x1ec] sm:$0xf] }
  0xad   :  { %1856 = vmatpush.bf16.msrb.mxu0 %v2650_v30  ;;  %v3190_v16 = vld [vmem:[#allocation2 + $0x434] sm:$0xf0]  ;;  %v2970_v23 = vor.u32 %v3290_v32, %v2969_v12  ;;  %v2825_v25 = vld [vmem:[#allocation2 + $0x628] sm:$0xf]  ;;  %v2286_v62 = vor.u32 %v3116_v20, %v2283_v53  ;;  %v3144_v6 = vld [vmem:[#allocation2 + $0x2cc] sm:$0xf] }
  0xae   :  { %1869 = vmatpush.bf16.msrb.mxu1 %v2778_v31  ;;  %v3222_v24 = vld [vmem:[#allocation2 + $0x534] sm:$0xf0]  ;;  %v2953_v28 = vld [vmem:[#allocation2 + $0x728] sm:$0xf]  ;;  %v2395_v7 = vld [vmem:[#allocation2 + $0x2d8] sm:$0xf0] }
  0xaf   :  { %1882 = vmatpush.bf16.msrb.mxu2 %v2906_v34  ;;  %v3254_v27 = vld [vmem:[#allocation2 + $0x634] sm:$0xf0]  ;;  %v2570_v34 = vor.u32 %v3190_v16, %v2569_v15  ;;  %v2553_v35 = vld [vmem:[#allocation2 + $0x408] sm:$0xf]  ;;  %v2698_v37 = vor.u32 %v3222_v24, %v2697_v17  ;;  %v3176_v8 = vld [vmem:[#allocation2 + $0x3cc] sm:$0xf]  ;;  %v2398_v32 = vor.u32 %v3144_v6, %v2395_v7 }
  0xb0   :  { %1895 = vmatpush.bf16.msrb.mxu3 %v3034_v39  ;;  %v3286_v30 = vld [vmem:[#allocation2 + $0x734] sm:$0xf0]  ;;  %v2826_v39 = vor.u32 %v3254_v27, %v2825_v25  ;;  %v2681_v40 = vld [vmem:[#allocation2 + $0x508] sm:$0xf]  ;;  %v1606_v55 = vpop.f32.mrf.mxu0  ;;  %v2123_v33 = vld [vmem:[#allocation2 + $0xb8] sm:$0xf0] }
  0xb1   :  { %1857 = vmatpush.bf16.msrb.mxu0 %v2634_v45  ;;  %v3186_v36 = vld [vmem:[#allocation2 + $0x414] sm:$0xf0]  ;;  %v2809_v42 = vld [vmem:[#allocation2 + $0x608] sm:$0xf]  ;;  %v2954_v44 = vor.u32 %v3286_v30, %v2953_v28  ;;  %v3421_v15 = vld [vmem:[#allocation1 + $0x36] sm:$0xff] }
  0xb2   :  { %1870 = vmatpush.bf16.msrb.mxu1 %v2762_v46  ;;  %v3218_v41 = vld [vmem:[#allocation2 + $0x514] sm:$0xf0]  ;;  %v2937_v46 = vld [vmem:[#allocation2 + $0x708] sm:$0xf]  ;;  %v2554_v52 = vor.u32 %v3186_v36, %v2553_v35  ;;  %v2251_v16 = vld [vmem:[#allocation2 + $0x1b8] sm:$0xf0] }
  0xb3   :  { %1883 = vmatpush.bf16.msrb.mxu2 %v2890_v47  ;;  %v3250_v45 = vld [vmem:[#allocation2 + $0x614] sm:$0xf0]  ;;  %v3140_v17 = vld [vmem:[#allocation2 + $0x2ac] sm:$0xf]  ;;  %v3424_v24 = vld [vmem:[#allocation1 + $0x24] sm:$0xff] }
  0xb4   :  { %1896 = vmatpush.bf16.msrb.mxu3 %v3018_v51  ;;  %v3282_v47 = vld [vmem:[#allocation2 + $0x714] sm:$0xf0]  ;;  %v2155_v51 = vld [vmem:[#allocation2 + $0xf8] sm:$0xf0]  ;;  %v3430_v28 = vld [vmem:[#allocation1 + $0x2d] sm:$0xff] }
  0xb5   :  { %1858 = vmatpush.bf16.msrb.mxu0 %v2618_v22  ;;  %v2158_v61 = vor.u32 %v3084_v50, %v2155_v51  ;;  %v3427_v25 = vld [vmem:[#allocation1 + $0x3f] sm:$0xff]  ;;  %v3104_v36 = vld [vmem:[#allocation2 + $0x18c] sm:$0xf] }
  0xb6   :  { %1871 = vmatpush.bf16.msrb.mxu1 %v2746_v26  ;;  %v1617_v19 = vpop.f32.mrf.mxu1  ;;  %v2682_v26 = vor.u32 %v3218_v41, %v2681_v40  ;;  %v2107_v35 = vld [vmem:[#allocation2 + $0x98] sm:$0xf0]  ;;  %v3136_v40 = vld [vmem:[#allocation2 + $0x28c] sm:$0xf] }
  0xb7   :  { %1884 = vmatpush.bf16.msrb.mxu2 %v2874_v56  ;;  %v1618_v31 = vadd.f32 %v1617_v19, %v1605_v18  ;;  %v2810_v56 = vor.u32 %v3250_v45, %v2809_v42  ;;  %v2379_v18 = vld [vmem:[#allocation2 + $0x2b8] sm:$0xf0]  ;;  %v3172_v19 = vld [vmem:[#allocation2 + $0x3ac] sm:$0xf] }
  0xb8   :  { %1897 = vmatpush.bf16.msrb.mxu3 %v3002_v60  ;;  %v2938_v60 = vor.u32 %v3282_v47, %v2937_v46  ;;  %v2363_v41 = vld [vmem:[#allocation2 + $0x298] sm:$0xf0]  ;;  %v3168_v42 = vld [vmem:[#allocation2 + $0x38c] sm:$0xf] }
  0xb9   :  { %1859 = vmatpush.bf16.msrb.mxu0 %v2602_v2  ;;  %v2139_v2 = vld [vmem:[#allocation2 + $0xd8] sm:$0xf0]  ;;  %v2366_v47 = vor.u32 %v3136_v40, %v2363_v41  ;;  %v3100_v50 = vld [vmem:[#allocation2 + $0x16c] sm:$0xf] }
  0xba   :  { %1872 = vmatpush.bf16.msrb.mxu1 %v2730_v4  ;;  %v2542_v4 = vor.u32 %v3180_v57, %v2539_v58  ;;  %v2142_v10 = vor.u32 %v3080_v1, %v2139_v2  ;;  %v2219_v53 = vld [vmem:[#allocation2 + $0x178] sm:$0xf0]  ;;  %v3132_v54 = vld [vmem:[#allocation2 + $0x26c] sm:$0xf] }
  0xbb   :  { %1885 = vmatpush.bf16.msrb.mxu2 %v2858_v5  ;;  %v1630_v43 = vpop.f32.mrf.mxu2  ;;  %v1643_v49 = vpop.f32.mrf.mxu3  ;;  %v2267_v5 = vld [vmem:[#allocation2 + $0x1d8] sm:$0xf0]  ;;  %v3164_v55 = vld [vmem:[#allocation2 + $0x36c] sm:$0xf]  ;;  %v2222_v58 = vor.u32 %v3100_v50, %v2219_v53 }
  0xbc   :  { %1898 = vmatpush.bf16.msrb.mxu3 %v2986_v29  ;;  %v1631_v48 = vadd.f32 %v1630_v43, %v1618_v31  ;;  %v2523_v29 = vld [vmem:[#allocation2 + $0x3d8] sm:$0xf0]  ;;  %v2270_v12 = vor.u32 %v3112_v3, %v2267_v5  ;;  %v2382_v31 = vor.u32 %v3140_v17, %v2379_v18  ;;  %v3128_v2 = vld [vmem:[#allocation2 + $0x24c] sm:$0xf] }
  0xbd   :  { %1860 = vmatpush.bf16.msrb.mxu0 %v2586_v13  ;;  %v3076_v13 = vld [vmem:[#allocation2 + $0xac] sm:$0xf]  ;;  %v2491_v43 = vld [vmem:[#allocation2 + $0x398] sm:$0xf0] }
  0xbe   :  { %1873 = vmatpush.bf16.msrb.mxu1 %v2714_v14  ;;  %v3419_v22 = vadd.f32 %v1643_v49, %v1631_v48  ;;  %v1619_v59 = vpop.f32.mrf.mxu1  ;;  %v3108_v14 = vld [vmem:[#allocation2 + $0x1ac] sm:$0xf]  ;;  %v2126_v27 = vor.u32 %v3076_v13, %v2123_v33  ;;  %v2091_v49 = vld [vmem:[#allocation2 + $0x78] sm:$0xf0] }
  0xbf   :  { %1886 = vmatpush.bf16.msrb.mxu2 %v2842_v38  ;;  %v2526_v38 = vor.u32 %v3176_v8, %v2523_v29  ;;  %v2254_v30 = vor.u32 %v3108_v14, %v2251_v16  ;;  %v3068_v48 = vld [vmem:[#allocation2 + $0x6c] sm:$0xf]  ;;  %v2347_v21 = vld [vmem:[#allocation2 + $0x278] sm:$0xf0] }
  0xc0   :  { %1899 = vmatpush.bf16.msrb.mxu3 %v2970_v23  ;;  %v2507_v23 = vld [vmem:[#allocation2 + $0x3b8] sm:$0xf0]  ;;  %v2094_v57 = vor.u32 %v3068_v48, %v2091_v49  ;;  %v2350_v59 = vor.u32 %v3132_v54, %v2347_v21  ;;  %v3160_v6 = vld [vmem:[#allocation2 + $0x34c] sm:$0xf] }
  0xc1   :  { %1861 = vmatpush.bf16.msrb.mxu0 %v2570_v34  ;;  %v3072_v34 = vld [vmem:[#allocation2 + $0x8c] sm:$0xf]  ;;  %v2203_v1 = vld [vmem:[#allocation2 + $0x158] sm:$0xf0] }
  0xc2   :  { %1874 = vmatpush.bf16.msrb.mxu1 %v2698_v37  ;;  %v2510_v37 = vor.u32 %v3172_v19, %v2507_v23  ;;  %v2331_v3 = vld [vmem:[#allocation2 + $0x258] sm:$0xf0]  ;;  %v3092_v13 = vld [vmem:[#allocation2 + $0x12c] sm:$0xf] }
  0xc3   :  { %1887 = vmatpush.bf16.msrb.mxu2 %v2826_v39  ;;  %v1632_v9 = vpop.f32.mrf.mxu2  ;;  %v1645_v11 = vpop.f32.mrf.mxu3  ;;  %v2235_v39 = vld [vmem:[#allocation2 + $0x198] sm:$0xf0]  ;;  %v3124_v16 = vld [vmem:[#allocation2 + $0x22c] sm:$0xf] }
  0xc4   :  { %1900 = vmatpush.bf16.msrb.mxu3 %v2954_v44  ;;  %v2110_v44 = vor.u32 %v3072_v34, %v2107_v35  ;;  %v2238_v46 = vor.u32 %v3104_v36, %v2235_v39  ;;  %v2459_v7 = vld [vmem:[#allocation2 + $0x358] sm:$0xf0]  ;;  %v2334_v11 = vor.u32 %v3128_v2, %v2331_v3  ;;  %v3156_v18 = vld [vmem:[#allocation2 + $0x32c] sm:$0xf] }
  0xc5   :  { %1862 = vmatpush.bf16.msrb.mxu0 %v2554_v52  ;;  %v1656_v45 = vpop.f32.mrf.mxu0  ;;  %v2494_v52 = vor.u32 %v3168_v42, %v2491_v43  ;;  %v2462_v14 = vor.u32 %v3160_v6, %v2459_v7  ;;  %v2315_v17 = vld [vmem:[#allocation2 + $0x238] sm:$0xf0]  ;;  %v3088_v35 = vld [vmem:[#allocation2 + $0x10c] sm:$0xf] }
  0xc6   :  { %1875 = vmatpush.bf16.msrb.mxu1 %v2682_v26  ;;  %v1657_v51 = vadd.f32 %v1656_v45, %v3419_v22  ;;  %v1669_v20 = vpop.f32.mrf.mxu1  ;;  %v2475_v26 = vld [vmem:[#allocation2 + $0x378] sm:$0xf0]  ;;  %v2318_v34 = vor.u32 %v3124_v16, %v2315_v17  ;;  %v3152_v42 = vld [vmem:[#allocation2 + $0x30c] sm:$0xf]  ;;  %v3321_v16 = vld [vmem:[#allocation1 + $0x9] sm:$0xff] }
  0xc7   :  { %1888 = vmatpush.bf16.msrb.mxu2 %v2810_v56  ;;  %v2478_v22 = vor.u32 %v3164_v55, %v2475_v26  ;;  %v2443_v19 = vld [vmem:[#allocation2 + $0x338] sm:$0xf0]  ;;  %v3212_v45 = vld [vmem:[#allocation2 + $0x4ec] sm:$0xf] }
  0xc8   :  { %1901 = vmatpush.bf16.msrb.mxu3 %v2938_v60  ;;  %1863 = vmatmul.bf16.vlgmr.msrb.gmra.mxu0 %v3424_v24  ;;  %v1670_v56 = vadd.f32 %v1669_v20, %v1657_v51  ;;  %v3064_v60 = vld [vmem:[#allocation2 + $0x4c] sm:$0xf]  ;;  %v2171_v36 = vld [vmem:[#allocation2 + $0x118] sm:$0xf0]  ;;  %v2446_v40 = vor.u32 %v3156_v18, %v2443_v19 }
  0xc9   :  { %1907 = vmatpush.bf16.msra.mxu0 %v2158_v61  ;;  %1876 = vmatmul.bf16.vlgmr.msrb.gmra.mxu1 %v3430_v28  ;;  %v2075_v61 = vld [vmem:[#allocation2 + $0x58] sm:$0xf0]  ;;  %v3276_v50 = vld [vmem:[#allocation2 + $0x6ec] sm:$0xf]  ;;  %v2174_v20 = vor.u32 %v3088_v35, %v2171_v36 }
  0xca   :  { %1920 = vmatpush.bf16.msra.mxu1 %v2286_v62  ;;  %1889 = vmatmul.bf16.vlgmr.msrb.gmra.mxu2 %v3421_v15  ;;  %v3096_v62 = vld [vmem:[#allocation2 + $0x14c] sm:$0xf]  ;;  %v2078_v8 = vor.u32 %v3064_v60, %v2075_v61  ;;  %v2299_v41 = vld [vmem:[#allocation2 + $0x218] sm:$0xf0] }
  0xcb   :  { %1933 = vmatpush.bf16.msra.mxu2 %v2414_v0  ;;  %1902 = vmatmul.bf16.vlgmr.msrb.gmra.mxu3 %v3427_v25  ;;  %v2427_v43 = vld [vmem:[#allocation2 + $0x318] sm:$0xf0]  ;;  %v3308_v53 = vld [vmem:[#allocation2 + $0x7ec] sm:$0xf] }
  0xcc   :  { %1946 = vmatpush.bf16.msra.mxu3 %v2542_v4  ;;  %v2795_v49 = vld [vmem:[#allocation2 + $0x5f8] sm:$0xf0]  ;;  %v2430_v21 = vor.u32 %v3152_v42, %v2427_v43  ;;  %v3236_v7 = vld [vmem:[#allocation2 + $0x5ac] sm:$0xf] }
  0xcd   :  { %1908 = vmatpush.bf16.msra.mxu0 %v2142_v10  ;;  %v1682_v0 = vpop.f32.mrf.mxu2  ;;  %v1658_v9 = vpop.f32.mrf.mxu0  ;;  %v2206_v10 = vor.u32 %v3096_v62, %v2203_v1  ;;  %v2923_v51 = vld [vmem:[#allocation2 + $0x6f8] sm:$0xf0]  ;;  %v3272_v62 = vld [vmem:[#allocation2 + $0x6cc] sm:$0xf] }
  0xce   :  { %1921 = vmatpush.bf16.msra.mxu1 %v2270_v12  ;;  %v1683_v4 = vadd.f32 %v1682_v0, %v1670_v56  ;;  %v1695_v5 = vpop.f32.mrf.mxu3  ;;  %v3060_v12 = vld [vmem:[#allocation2 + $0x2c] sm:$0xf]  ;;  %v1671_v33 = vpop.f32.mrf.mxu1  ;;  %v3051_v54 = vld [vmem:[#allocation2 + $0x7f8] sm:$0xf0]  ;;  %v2926_v56 = vor.u32 %v3276_v50, %v2923_v51 }
  0xcf   :  { %1934 = vmatpush.bf16.msra.mxu2 %v2398_v32  ;;  %v2059_v32 = vld [vmem:[#allocation2 + $0x38] sm:$0xf0]  ;;  %v3054_v60 = vor.u32 %v3308_v53, %v3051_v54  ;;  %v3318_v9 = vld [vmem:[#allocation1 + $0x12] sm:$0xff] }
  0xd0   :  { %1947 = vmatpush.bf16.msra.mxu3 %v2526_v38  ;;  %v3434_v29 = vadd.f32 %v1695_v5, %v1683_v4  ;;  %v2187_v38 = vld [vmem:[#allocation2 + $0x138] sm:$0xf0]  ;;  %v2062_v23 = vor.u32 %v3060_v12, %v2059_v32  ;;  %v3204_v5 = vld [vmem:[#allocation2 + $0x4ac] sm:$0xf]  ;;  %v3319_v32 = vld [vmem:[#allocation1 + $0x1b] sm:$0xff] }
  0xd1   :  { %1909 = vmatpush.bf16.msra.mxu0 %v2126_v27  ;;  %v3056_v27 = vld [vmem:[#allocation2 + $0xc] sm:$0xf]  ;;  %v2779_v61 = vld [vmem:[#allocation2 + $0x5d8] sm:$0xf0] }
  0xd2   :  { %1922 = vmatpush.bf16.msra.mxu1 %v2254_v30  ;;  %v2043_v30 = vld [vmem:[#allocation2 + $0x18] sm:$0xf0]  ;;  %v3200_v17 = vld [vmem:[#allocation2 + $0x48c] sm:$0xf] }
  0xd3   :  { %1935 = vmatpush.bf16.msra.mxu2 %v2382_v31  ;;  %v2190_v31 = vor.u32 %v3092_v13, %v2187_v38  ;;  %v2046_v48 = vor.u32 %v3056_v27, %v2043_v30  ;;  %v2907_v0 = vld [vmem:[#allocation2 + $0x6d8] sm:$0xf0]  ;;  %v3300_v13 = vld [vmem:[#allocation2 + $0x7ac] sm:$0xf]  ;;  %v290_v30 = vperm.slane %v3416_v63, 1 }
  0xd4   :  { %1948 = vmatpush.bf16.msra.mxu3 %v2510_v37  ;;  %v3120_v37 = vld [vmem:[#allocation2 + $0x20c] sm:$0xf]  ;;  %v3035_v1 = vld [vmem:[#allocation2 + $0x7d8] sm:$0xf0]  ;;  %v2910_v4 = vor.u32 %v3272_v62, %v2907_v0 }
  0xd5   :  { %1910 = vmatpush.bf16.msra.mxu0 %v2110_v44  ;;  %v1684_v39 = vpop.f32.mrf.mxu2  ;;  %v2635_v6 = vld [vmem:[#allocation2 + $0x4b8] sm:$0xf0]  ;;  %v3232_v27 = vld [vmem:[#allocation2 + $0x58c] sm:$0xf] }
  0xd6   :  { %1923 = vmatpush.bf16.msra.mxu1 %v2238_v46  ;;  %v1697_v44 = vpop.f32.mrf.mxu3  ;;  %v2667_v46 = vld [vmem:[#allocation2 + $0x4f8] sm:$0xf0]  ;;  %v2638_v38 = vor.u32 %v3204_v5, %v2635_v6  ;;  %v3264_v35 = vld [vmem:[#allocation2 + $0x68c] sm:$0xf] }
  0xd7   :  { %1936 = vmatpush.bf16.msra.mxu2 %v2366_v47  ;;  %v3244_v47 = vld [vmem:[#allocation2 + $0x5ec] sm:$0xf]  ;;  %v2670_v55 = vor.u32 %v3212_v45, %v2667_v46  ;;  %v2891_v12 = vld [vmem:[#allocation2 + $0x6b8] sm:$0xf0] }
  0xd8   :  { %1949 = vmatpush.bf16.msra.mxu3 %v2494_v52  ;;  %v2302_v52 = vor.u32 %v3120_v37, %v2299_v41  ;;  %v2798_v26 = vor.u32 %v3244_v47, %v2795_v49  ;;  %v3019_v33 = vld [vmem:[#allocation2 + $0x7b8] sm:$0xf0]  ;;  %v3296_v37 = vld [vmem:[#allocation2 + $0x78c] sm:$0xf] }
  0xd9   :  { %1911 = vmatpush.bf16.msra.mxu0 %v2094_v57  ;;  %v3208_v57 = vld [vmem:[#allocation2 + $0x4cc] sm:$0xf]  ;;  %v2875_v36 = vld [vmem:[#allocation2 + $0x698] sm:$0xf0] }
  0xda   :  { %1924 = vmatpush.bf16.msra.mxu1 %v2222_v58  ;;  %v2651_v58 = vld [vmem:[#allocation2 + $0x4d8] sm:$0xf0]  ;;  %v2878_v43 = vor.u32 %v3264_v35, %v2875_v36  ;;  %v3196_v44 = vld [vmem:[#allocation2 + $0x46c] sm:$0xf] }
  0xdb   :  { %1937 = vmatpush.bf16.msra.mxu2 %v2350_v59  ;;  %v3240_v59 = vld [vmem:[#allocation2 + $0x5cc] sm:$0xf]  ;;  %v2654_v2 = vor.u32 %v3208_v57, %v2651_v58  ;;  %v3003_v39 = vld [vmem:[#allocation2 + $0x798] sm:$0xf0] }
  0xdc   :  { %1950 = vmatpush.bf16.msra.mxu3 %v2478_v22  ;;  %v3304_v22 = vld [vmem:[#allocation2 + $0x7cc] sm:$0xf]  ;;  %v2782_v3 = vor.u32 %v3240_v59, %v2779_v61  ;;  %v2603_v45 = vld [vmem:[#allocation2 + $0x478] sm:$0xf0]  ;;  %v3006_v49 = vor.u32 %v3296_v37, %v3003_v39 }
  0xdd   :  { %1912 = vmatpush.bf16.msra.mxu0 %v2078_v8  ;;  %v3038_v8 = vor.u32 %v3304_v22, %v3035_v1  ;;  %v3228_v46 = vld [vmem:[#allocation2 + $0x56c] sm:$0xf]  ;;  %v2731_v50 = vld [vmem:[#allocation2 + $0x578] sm:$0xf0] }
  0xde   :  { %1925 = vmatpush.bf16.msra.mxu1 %v2206_v10  ;;  %v2763_v10 = vld [vmem:[#allocation2 + $0x5b8] sm:$0xf0]  ;;  %v3260_v51 = vld [vmem:[#allocation2 + $0x66c] sm:$0xf] }
  0xdf   :  { %1938 = vmatpush.bf16.msra.mxu2 %v2334_v11  ;;  %v3268_v11 = vld [vmem:[#allocation2 + $0x6ac] sm:$0xf]  ;;  %v2766_v18 = vor.u32 %v3236_v7, %v2763_v10  ;;  %v2987_v53 = vld [vmem:[#allocation2 + $0x778] sm:$0xf0] }
  0xe0   :  { %1951 = vmatpush.bf16.msra.mxu3 %v2462_v14  ;;  %v3320_v14 = vld [vmem:[#allocation1] sm:$0xff]  ;;  %v2894_v19 = vor.u32 %v3268_v11, %v2891_v12  ;;  %v3224_v58 = vld [vmem:[#allocation2 + $0x54c] sm:$0xf] }
  0xe1   :  { %1913 = vmatpush.bf16.msra.mxu0 %v2062_v23  ;;  %v2619_v23 = vld [vmem:[#allocation2 + $0x498] sm:$0xf0]  ;;  %v3256_v62 = vld [vmem:[#allocation2 + $0x64c] sm:$0xf] }
  0xe2   :  { %1926 = vmatpush.bf16.msra.mxu1 %v2190_v31  ;;  %v3022_v31 = vor.u32 %v3300_v13, %v3019_v33  ;;  %v2587_v57 = vld [vmem:[#allocation2 + $0x458] sm:$0xf0]  ;;  %v3220_v11 = vld [vmem:[#allocation2 + $0x52c] sm:$0xf] }
  0xe3   :  { %1939 = vmatpush.bf16.msra.mxu2 %v2318_v34  ;;  %v2747_v34 = vld [vmem:[#allocation2 + $0x598] sm:$0xf0]  ;;  %v3252_v33 = vld [vmem:[#allocation2 + $0x62c] sm:$0xf] }
  0xe4   :  { %1952 = vmatpush.bf16.msra.mxu3 %v2446_v40  ;;  %v2622_v40 = vor.u32 %v3200_v17, %v2619_v23  ;;  %v2750_v42 = vor.u32 %v3232_v27, %v2747_v34  ;;  %v2715_v61 = vld [vmem:[#allocation2 + $0x558] sm:$0xf0]  ;;  %v3184_v23 = vld [vmem:[#allocation2 + $0x40c] sm:$0xf] }
  0xe5   :  { %1914 = vmatpush.bf16.msra.mxu0 %v2046_v48  ;;  %v1708_v41 = vpop.f32.mrf.mxu0  ;;  %v2843_v0 = vld [vmem:[#allocation2 + $0x658] sm:$0xf0]  ;;  %v2718_v7 = vor.u32 %v3224_v58, %v2715_v61  ;;  %v3248_v36 = vld [vmem:[#allocation2 + $0x60c] sm:$0xf] }
  0xe6   :  { %1927 = vmatpush.bf16.msra.mxu1 %v2174_v20  ;;  %v1709_v47 = vadd.f32 %v1708_v41, %v290_v30  ;;  %v1721_v48 = vpop.f32.mrf.mxu1  ;;  %v2859_v20 = vld [vmem:[#allocation2 + $0x678] sm:$0xf0]  ;;  %v3216_v30 = vld [vmem:[#allocation2 + $0x50c] sm:$0xf] }
  0xe7   :  { %1940 = vmatpush.bf16.msra.mxu2 %v2302_v52  ;;  %v3292_v52 = vld [vmem:[#allocation2 + $0x76c] sm:$0xf]  ;;  %v2571_v10 = vld [vmem:[#allocation2 + $0x438] sm:$0xf0] }
  0xe8   :  { %1953 = vmatpush.bf16.msra.mxu3 %v2430_v21  ;;  %1915 = vmatmul.bf16.vlgmr.msra.gmra.mxu0 %v3320_v14  ;;  %v1722_v54 = vadd.f32 %v1721_v48, %v1709_v47  ;;  %v2606_v21 = vor.u32 %v3196_v44, %v2603_v45  ;;  %v2699_v13 = vld [vmem:[#allocation2 + $0x538] sm:$0xf0] }
  0xe9   :  { %1959 = vmatpush.bf16.msrb.mxu0 %v2670_v55  ;;  %1928 = vmatmul.bf16.vlgmr.msra.gmra.mxu1 %v3321_v16  ;;  %v2734_v55 = vor.u32 %v3228_v46, %v2731_v50  ;;  %v2827_v14 = vld [vmem:[#allocation2 + $0x638] sm:$0xf0] }
  0xea   :  { %1972 = vmatpush.bf16.msrb.mxu1 %v2798_v26  ;;  %1941 = vmatmul.bf16.vlgmr.msra.gmra.mxu2 %v3318_v9  ;;  %v2862_v26 = vor.u32 %v3260_v51, %v2859_v20  ;;  %v3188_v9 = vld [vmem:[#allocation2 + $0x42c] sm:$0xf]  ;;  %v2955_v16 = vld [vmem:[#allocation2 + $0x738] sm:$0xf0] }
  0xeb   :  { %1985 = vmatpush.bf16.msrb.mxu2 %v2926_v56  ;;  %1954 = vmatmul.bf16.vlgmr.msra.gmra.mxu3 %v3319_v32  ;;  %v3192_v56 = vld [vmem:[#allocation2 + $0x44c] sm:$0xf]  ;;  %v2574_v17 = vor.u32 %v3188_v9, %v2571_v10  ;;  %v2555_v27 = vld [vmem:[#allocation2 + $0x418] sm:$0xf0] }
  0xec   :  { %1998 = vmatpush.bf16.msrb.mxu3 %v3054_v60  ;;  %v2990_v60 = vor.u32 %v3292_v52, %v2987_v53  ;;  %v2683_v35 = vld [vmem:[#allocation2 + $0x518] sm:$0xf0] }
  0xed   :  { %1960 = vmatpush.bf16.msrb.mxu0 %v2654_v2  ;;  %v1734_v59 = vpop.f32.mrf.mxu2  ;;  %v3288_v2 = vld [vmem:[#allocation2 + $0x74c] sm:$0xf]  ;;  %v1710_v6 = vpop.f32.mrf.mxu0  ;;  %v2811_v37 = vld [vmem:[#allocation2 + $0x618] sm:$0xf0] }
  0xee   :  { %1973 = vmatpush.bf16.msrb.mxu1 %v2782_v3  ;;  %v1735_v22 = vadd.f32 %v1734_v59, %v1722_v54  ;;  %v1747_v1 = vpop.f32.mrf.mxu3  ;;  %v2971_v3 = vld [vmem:[#allocation2 + $0x758] sm:$0xf0]  ;;  %v1723_v12 = vpop.f32.mrf.mxu1  ;;  %v2814_v44 = vor.u32 %v3248_v36, %v2811_v37 }
  0xef   :  { %1986 = vmatpush.bf16.msrb.mxu2 %v2910_v4  ;;  %v2590_v4 = vor.u32 %v3192_v56, %v2587_v57  ;;  %v2974_v32 = vor.u32 %v3288_v2, %v2971_v3  ;;  %v2939_v41 = vld [vmem:[#allocation2 + $0x718] sm:$0xf0] }
  0xf0   :  { %1999 = vmatpush.bf16.msrb.mxu3 %v3038_v8  ;;  %v1748_v5 = vadd.f32 %v1747_v1, %v1735_v22  ;;  %v2846_v8 = vor.u32 %v3256_v62, %v2843_v0 }
  0xf1   :  { %1961 = vmatpush.bf16.msrb.mxu0 %v2638_v38  ;;  %v3284_v38 = vld [vmem:[#allocation2 + $0x72c] sm:$0xf] }
  0xf2   :  { %1974 = vmatpush.bf16.msrb.mxu1 %v2766_v18  ;;  %v2702_v18 = vor.u32 %v3220_v11, %v2699_v13  ;;  %v2958_v34 = vor.u32 %v3284_v38, %v2955_v16 }
  0xf3   :  { %1987 = vmatpush.bf16.msrb.mxu2 %v2894_v19  ;;  %v2830_v19 = vor.u32 %v3252_v33, %v2827_v14  ;;  %v292_v33 = vperm.slane %v3416_v63, 3 }
  0xf4   :  { %2000 = vmatpush.bf16.msrb.mxu3 %v3022_v31 }
  0xf5   :  { %1962 = vmatpush.bf16.msrb.mxu0 %v2622_v40  ;;  %v1736_v31 = vpop.f32.mrf.mxu2  ;;  %v3280_v40 = vld [vmem:[#allocation2 + $0x70c] sm:$0xf] }
  0xf6   :  { %1975 = vmatpush.bf16.msrb.mxu1 %v2750_v42  ;;  %v1749_v39 = vpop.f32.mrf.mxu3  ;;  %v2558_v42 = vor.u32 %v3184_v23, %v2555_v27  ;;  %v2942_v45 = vor.u32 %v3280_v40, %v2939_v41 }
  0xf7   :  { %1988 = vmatpush.bf16.msrb.mxu2 %v2878_v43  ;;  %v2686_v43 = vor.u32 %v3216_v30, %v2683_v35 }
  0xf8   :  { %2001 = vmatpush.bf16.msrb.mxu3 %v3006_v49 }
  0xf9   :  { %1963 = vmatpush.bf16.msrb.mxu0 %v2606_v21 }
  0xfa   :  { %1976 = vmatpush.bf16.msrb.mxu1 %v2734_v55 }
  0xfb   :  { %1989 = vmatpush.bf16.msrb.mxu2 %v2862_v26 }
  0xfc   :  { %2002 = vmatpush.bf16.msrb.mxu3 %v2990_v60 }
  0xfd   :  { %1964 = vmatpush.bf16.msrb.mxu0 %v2590_v4 }
  0xfe   :  { %1977 = vmatpush.bf16.msrb.mxu1 %v2718_v7 }
  0xff   :  { %1990 = vmatpush.bf16.msrb.mxu2 %v2846_v8 }
 0x100   :  { %2003 = vmatpush.bf16.msrb.mxu3 %v2974_v32 }
 0x101   :  { %1965 = vmatpush.bf16.msrb.mxu0 %v2574_v17 }
 0x102   :  { %1978 = vmatpush.bf16.msrb.mxu1 %v2702_v18 }
 0x103   :  { %1991 = vmatpush.bf16.msrb.mxu2 %v2830_v19 }
 0x104   :  { %2004 = vmatpush.bf16.msrb.mxu3 %v2958_v34 }
 0x105   :  { %1966 = vmatpush.bf16.msrb.mxu0 %v2558_v42  ;;  %v1760_v46 = vpop.f32.mrf.mxu0 }
 0x106   :  { %1979 = vmatpush.bf16.msrb.mxu1 %v2686_v43  ;;  %v1761_v47 = vadd.f32 %v1760_v46, %v1748_v5  ;;  %v1773_v48 = vpop.f32.mrf.mxu1 }
 0x107   :  { %1992 = vmatpush.bf16.msrb.mxu2 %v2814_v44 }
 0x108   :  { %2005 = vmatpush.bf16.msrb.mxu3 %v2942_v45  ;;  %1967 = vmatmul.bf16.vlgmr.msrb.gmra.mxu0 %v3424_v24  ;;  %v1774_v49 = vadd.f32 %v1773_v48, %v1761_v47 }
 0x109   :  { %1980 = vmatmul.bf16.vlgmr.msrb.gmra.mxu1 %v3430_v28 }
 0x10a   :  { %1993 = vmatmul.bf16.vlgmr.msrb.gmra.mxu2 %v3421_v15  ;;  %v291_v15 = vperm.slane %v3416_v63, 2 }
 0x10b   :  { %2006 = vmatmul.bf16.vlgmr.msrb.gmra.mxu3 %v3427_v25 }
 0x10d   :  { %v1786_v50 = vpop.f32.mrf.mxu2  ;;  %v1762_v53 = vpop.f32.mrf.mxu0 }
 0x10e   :  { %v1787_v51 = vadd.f32 %v1786_v50, %v1774_v49  ;;  %v1799_v20 = vpop.f32.mrf.mxu3  ;;  %v1775_v54 = vpop.f32.mrf.mxu1 }
 0x110   :  { %v1800_v52 = vadd.f32 %v1799_v20, %v1787_v51 }
 0x112   :  { %v2015_v21 = vrot.slane %v1800_v52, 6 }
 0x114   :  { %v2019_v24 = vsel %vm2018_vm0, %v3434_v29, %v2015_v21 }
 0x115   :  { %v1788_v55 = vpop.f32.mrf.mxu2 }
 0x116   :  { %v1801_v28 = vpop.f32.mrf.mxu3 }
 0x125   :  { %v1812_v26 = vpop.f32.mrf.mxu0 }
 0x126   :  { %v1813_v25 = vadd.f32 %v1812_v26, %v291_v15  ;;  %v1825_v56 = vpop.f32.mrf.mxu1 }
 0x128   :  { %v1826_v57 = vadd.f32 %v1825_v56, %v1813_v25 }
 0x12d   :  { %v1838_v58 = vpop.f32.mrf.mxu2  ;;  %v1814_v62 = vpop.f32.mrf.mxu0 }
 0x12e   :  { %v1839_v59 = vadd.f32 %v1838_v58, %v1826_v57  ;;  %v1851_v60 = vpop.f32.mrf.mxu3  ;;  %v1827_v0 = vpop.f32.mrf.mxu1 }
 0x130   :  { %v1852_v61 = vadd.f32 %v1851_v60, %v1839_v59 }
 0x135   :  { %v1840_v22 = vpop.f32.mrf.mxu2 }
 0x136   :  { %v1853_v1 = vpop.f32.mrf.mxu3 }
 0x145   :  { %v1864_v2 = vpop.f32.mrf.mxu0 }
 0x146   :  { %v1877_v3 = vpop.f32.mrf.mxu1  ;;  %v1865_v18 = vadd.f32 %v1864_v2, %v1852_v61 }
 0x148   :  { %v1878_v23 = vadd.f32 %v1877_v3, %v1865_v18 }
 0x14d   :  { %v1890_v4 = vpop.f32.mrf.mxu2  ;;  %v1866_v5 = vpop.f32.mrf.mxu0 }
 0x14e   :  { %v1903_v29 = vpop.f32.mrf.mxu3  ;;  %v1879_v6 = vpop.f32.mrf.mxu1  ;;  %v1891_v35 = vadd.f32 %v1890_v4, %v1878_v23 }
 0x150   :  { %v1904_v39 = vadd.f32 %v1903_v29, %v1891_v35 }
 0x152   :  { %v2016_v44 = vrot.slane %v1904_v39, 4 }
 0x155   :  { %v1892_v7 = vpop.f32.mrf.mxu2 }
 0x156   :  { %v1905_v8 = vpop.f32.mrf.mxu3 }
 0x165   :  { %v1916_v9 = vpop.f32.mrf.mxu0 }
 0x166   :  { %v1929_v10 = vpop.f32.mrf.mxu1  ;;  %v1917_v16 = vadd.f32 %v1916_v9, %v292_v33 }
 0x168   :  { %v1930_v17 = vadd.f32 %v1929_v10, %v1917_v16 }
 0x16d   :  { %v1942_v11 = vpop.f32.mrf.mxu2  ;;  %v1918_v32 = vpop.f32.mrf.mxu0 }
 0x16e   :  { %v1955_v12 = vpop.f32.mrf.mxu3  ;;  %v1931_v13 = vpop.f32.mrf.mxu1  ;;  %v1943_v19 = vadd.f32 %v1942_v11, %v1930_v17 }
 0x170   :  { %v1956_v27 = vadd.f32 %v1955_v12, %v1943_v19 }
 0x175   :  { %v1944_v14 = vpop.f32.mrf.mxu2 }
 0x176   :  { %v1957_v38 = vpop.f32.mrf.mxu3 }
 0x185   :  { %v1968_v30 = vpop.f32.mrf.mxu0 }
 0x186   :  { %v1981_v31 = vpop.f32.mrf.mxu1  ;;  %v1969_v34 = vadd.f32 %v1968_v30, %v1956_v27 }
 0x188   :  { %v1982_v36 = vadd.f32 %v1981_v31, %v1969_v34 }
 0x18d   :  { %v1994_v37 = vpop.f32.mrf.mxu2  ;;  %v1970_v42 = vpop.f32.mrf.mxu0 }
 0x18e   :  { %v1995_v40 = vadd.f32 %v1994_v37, %v1982_v36  ;;  %v2007_v41 = vpop.f32.mrf.mxu3  ;;  %v1983_v43 = vpop.f32.mrf.mxu1 }
 0x190   :  { %v2008_v63 = vadd.f32 %v2007_v41, %v1995_v40 }
 0x192   :  { %v2017_v45 = vrot.slane %v2008_v63, 2 }
 0x194   :  { %v2021_v46 = vsel %vm2020_vm1, %v2016_v44, %v2017_v45 }
 0x195   :  { %v2023_v47 = vsel %vm2022_vm2, %v2019_v24, %v2021_v46  ;;  %v1996_v48 = vpop.f32.mrf.mxu2 }
 0x196   :  { %2025 = vst [vmem:[%s3450_s3] sm:$0xff] %v2023_v47  ;;  %v2009_v49 = vpop.f32.mrf.mxu3 }
 0x197   :  { %2030 = vsyncpa [#allocation3], 1 }

</bundles_post_ra>
